<compile_context>
chip_gen: v5e
topology: v5e:2x2
jax: 0.10.0
libtpu: 0.0.40
codegen_flags: <defaults>
</compile_context>

<pallas_src>
import functools
import math

import jax
import jax.numpy as jnp
from jax.experimental import pallas as pl
from jax.experimental.pallas import tpu as pltpu

_HIGHEST = jax.lax.Precision.HIGHEST


# ------------------------------- module glue -------------------------------

def expend_params(value, length):
    if isinstance(value, list):
        if len(value) == length:
            return value
        return [value for _ in range(length)]
    return [value for _ in range(length)]


def conv_weight(key, k, cout, cin):
    # matches:  m.weight.data.normal_(0, sqrt(2 / (kernel_size * out_channels)))
    std = math.sqrt(2.0 / (k * cout))
    return jax.random.normal(key, (k, cout, cin), jnp.float32) * std


def bn_fold_params(c, eps=1e-5):
    """Inference BatchNorm1d as per-channel (scale, bias). Fresh-module stats."""
    gamma = jnp.ones((c, 1), jnp.float32)
    beta = jnp.zeros((c, 1), jnp.float32)
    mean = jnp.zeros((c, 1), jnp.float32)
    var = jnp.ones((c, 1), jnp.float32)
    scale = gamma * jax.lax.rsqrt(var + eps)
    bias = beta - mean * scale
    return scale, bias


# ------------------------------ Pallas kernel -------------------------------

def _fused_resnet_kernel(seq_len,
                         x_ref,
                         w1_0_ref, b1_0_ref, w2_0_ref, b2_0_ref,
                         wd_0_ref, bd_0_ref,
                         w1s_ref, b1s_ref, w2s_ref, b2s_ref,
                         o_ref):
    """One lane-packed slab: runs the whole BasicBlock1D stack in-VMEM.

    x_ref:  (Cin, lanes) f32 with lanes = lane_batch * seq_len
    w1_0:   (C, 3*Cin) f32   b1_0: (C,1) f32      (block 0 conv1, BN folded)
    w2_0:   (C, 3*C)   f32   b2_0: (C,1) f32      (block 0 conv2, BN folded)
    wd_0:   (C, Cin)   f32   bd_0: (C,1) f32      (block 0 1x1 downsample, BN folded)
    w1s:    (B-1, C, 3*C) f32,  b1s: (B-1, C, 1)  (identity blocks)
    w2s:    (B-1, C, 3*C) f32,  b2s: (B-1, C, 1)
    o_ref:  (C, lanes)
    """
    f32 = jnp.float32
    x = x_ref[...].astype(f32)
    lanes = x.shape[1]

    # Hoisted sequence-edge masks (built once, reused by all 16 convs).
    # lane % seq_len handles several packed sequences in the lane dimension.
    pos = jax.lax.broadcasted_iota(jnp.int32, (1, lanes), 1) % seq_len
    not_left = (pos != 0).astype(f32)             # zero at each sequence start
    not_right = (pos != seq_len - 1).astype(f32)  # zero at each sequence end

    def im2col3(a):
        # (C, lanes) -> (3*C, lanes) = [a[l-1]; a[l]; a[l+1]] with zero padding
        # at per-sequence boundaries.  Rolls use the XLU slot; masks are cheap
        # broadcast multiplies.
        a_m1 = pltpu.roll(a, shift=1, axis=1) * not_left
        a_p1 = pltpu.roll(a, shift=lanes - 1, axis=1) * not_right
        return jnp.concatenate([a_m1, a, a_p1], axis=0)

    def conv3_bn(a, w, b):
        # Single MXU matmul (K = 3*C), f32 operands, HIGHEST precision, f32 bias.
        rhs = im2col3(a)
        return jnp.dot(w, rhs, preferred_element_type=f32,
                       precision=_HIGHEST) + b

    # ---- block 0: projection residual (1x1 conv + BN folded into wd/bd) ----
    h = jnp.maximum(conv3_bn(x, w1_0_ref[...], b1_0_ref[...]), 0.0)
    o = conv3_bn(h, w2_0_ref[...], b2_0_ref[...])
    r = jnp.dot(wd_0_ref[...], x, preferred_element_type=f32,
                precision=_HIGHEST) + bd_0_ref[...]
    x = jnp.maximum(o + r, 0.0)

    # ---- remaining identity blocks (stacked weights, dynamic leading index) ----
    n_rest = w1s_ref.shape[0]

    def body(k, xc):
        hh = jnp.maximum(conv3_bn(xc, w1s_ref[k], b1s_ref[k]), 0.0)
        oo = conv3_bn(hh, w2s_ref[k], b2s_ref[k])
        return jnp.maximum(oo + xc, 0.0)

    x = jax.lax.fori_loop(0, n_rest, body, x)

    o_ref[...] = x.astype(o_ref.dtype)            # single lane-dense store


# --------------------------- parameter construction -------------------------

def build_resnet1d_params(key, block_num=2, in_channels=64, hidden_channels=256,
                          stride=1, expansion=1, eps=1e-5):
    layer_num = 4
    hc = expend_params(hidden_channels, layer_num)
    st = expend_params(stride, layer_num)
    ex = expend_params(expansion, layer_num)
    bn = expend_params(block_num, layer_num)

    raw = []                       # PyTorch-equivalent params (f32 reference)
    in_planes = in_channels
    length_retract = 1
    for li in range(layer_num):
        length_retract *= st[li]
        for bi in range(bn[li]):
            s = st[li] if bi == 0 else 1
            assert s == 1, "TODO(synk): strided path not implemented"
            out_c = int(hc[li] * ex[li])
            key, k1, k2, k3 = jax.random.split(key, 4)
            p = {"w1": conv_weight(k1, 3, hc[li], in_planes),
                 "w2": conv_weight(k2, 3, out_c, hc[li])}
            p["s1"], p["b1"] = bn_fold_params(hc[li], eps)
            p["s2"], p["b2"] = bn_fold_params(out_c, eps)
            if s != 1 or in_planes != out_c:
                p["wd"] = conv_weight(k3, 1, out_c, in_planes)[0]   # (Cout, Cin)
                p["sd"], p["bd"] = bn_fold_params(out_c, eps)
            raw.append(p)
            in_planes = out_c

    # Pack for the fused kernel: block 0 carries the projection downsample,
    # all remaining blocks are identical identity blocks (default config path).
    first, rest = raw[0], raw[1:]
    assert "wd" in first, "TODO(synk): first-block identity path not packed"
    assert len(rest) >= 1, "TODO(synk): single-block config not packed"
    assert all("wd" not in p for p in rest)
    assert all(p["w1"].shape == rest[0]["w1"].shape and
               p["w2"].shape == rest[0]["w2"].shape for p in rest), \
        "TODO(synk): heterogeneous per-layer channels not packed"

    def fold3(w, s):  # (3,Cout,Cin),(Cout,1) -> BN-folded (Cout, 3*Cin) f32
        return s * jnp.concatenate([w[0], w[1], w[2]], axis=1)

    packed = {
        "w1_0": fold3(first["w1"], first["s1"]), "b1_0": first["b1"],
        "w2_0": fold3(first["w2"], first["s2"]), "b2_0": first["b2"],
        "wd_0": first["sd"] * first["wd"], "bd_0": first["bd"],
        "w1s": jnp.stack([fold3(p["w1"], p["s1"]) for p in rest]),
        "b1s": jnp.stack([p["b1"] for p in rest]),
        "w2s": jnp.stack([fold3(p["w2"], p["s2"]) for p in rest]),
        "b2s": jnp.stack([p["b2"] for p in rest]),
    }
    return packed, raw, length_retract


# ------------------------------ forward wrapper ------------------------------

def resnet1d_forward(x, packed, length=None, length_retract=1,
                     lane_batch=None, out_dtype=jnp.float32):
    n, cin, L = x.shape
    c_out = packed["w2_0"].shape[0]
    n_rest = packed["w1s"].shape[0]

    # Pack batch elements into the lane dimension: widens every matmul's N dim
    # (better MXU fill) and amortizes per-grid-step overhead.  lane_batch is the
    # largest divisor of N with lane_batch*L <= ~256 lanes per step (keeps a
    # multi-step "parallel" grid for v7x megacore when N allows it).
    if lane_batch is None:
        target = max(1, 256 // L)
        lane_batch = 1
        for nb in range(min(n, target), 0, -1):
            if n % nb == 0:
                lane_batch = nb
                break
    assert n % lane_batch == 0
    tile = lane_batch * L                       # multiple of L and of 128

    # Layout plumbing in the wrapper: (N, Cin, L) -> (Cin, N*L) lane-dense slab.
    x_packed = jnp.transpose(x, (1, 0, 2)).reshape(cin, n * L)

    weight_names = ["w1_0", "b1_0", "w2_0", "b2_0", "wd_0", "bd_0",
                    "w1s", "b1s", "w2s", "b2s"]
    weights = [packed[k] for k in weight_names]

    def full_spec(a):
        nd = a.ndim
        # TODO(synk): pipeline_mode=pl.Buffered(1) for constant-index weights
        # once VMEM budget matters (hidden=256 on v7x 64 MiB / v5e 16 MiB).
        return pl.BlockSpec(a.shape, lambda i, _nd=nd: (0,) * _nd)

    # Advisory cost estimate for XLA scheduling around the fused call.
    lanes_total = n * L
    mm = lambda m, k: 2 * m * k * lanes_total
    flops = (mm(c_out, 3 * cin) + mm(c_out, 3 * c_out) + mm(c_out, cin)
             + n_rest * 2 * mm(c_out, 3 * c_out))
    bytes_accessed = (x.size * x.dtype.itemsize
                      + sum(int(w.size) * w.dtype.itemsize for w in weights)
                      + c_out * lanes_total * jnp.dtype(out_dtype).itemsize)
    cost = pl.CostEstimate(flops=int(flops), transcendentals=0,
                           bytes_accessed=int(bytes_accessed))

    out_packed = pl.pallas_call(
        functools.partial(_fused_resnet_kernel, L),
        out_shape=jax.ShapeDtypeStruct((c_out, n * L), out_dtype),
        grid=(n // lane_batch,),
        in_specs=[pl.BlockSpec((cin, tile), lambda i: (0, i))]
                 + [full_spec(a) for a in weights],
        out_specs=pl.BlockSpec((c_out, tile), lambda i: (0, i)),
        compiler_params=pltpu.CompilerParams(
            dimension_semantics=("parallel",),
            # Plenty for the demo shapes; re-derive the L tile / lane_batch for
            # hidden_channels=256 on v7x (64 MiB physical) and v5e (16 MiB
            # default scoped VMEM).
            vmem_limit_bytes=32 * 1024 * 1024),
        cost_estimate=cost,
    )(x_packed, *weights)

    out = jnp.transpose(out_packed.reshape(c_out, n, L), (1, 0, 2))

    if length is not None:
        length = (length / length_retract).astype(jnp.int32)
    return out, length


# ----------------------- reference for verification ------------------------

def _conv3_raw_ref(x, w):
    xp = jnp.pad(x, ((0, 0), (0, 0), (1, 1)))
    return (jnp.einsum("oc,ncl->nol", w[0], xp[:, :, :-2], precision=_HIGHEST) +
            jnp.einsum("oc,ncl->nol", w[1], xp[:, :, 1:-1], precision=_HIGHEST) +
            jnp.einsum("oc,ncl->nol", w[2], xp[:, :, 2:], precision=_HIGHEST))


def _forward_ref_raw(x, raw):
    """Pure-f32 reference with un-folded BN (PyTorch eval-mode float semantics)."""
    for p in raw:
        h = jnp.maximum(_conv3_raw_ref(x, p["w1"]) * p["s1"][None] + p["b1"][None], 0.0)
        o = _conv3_raw_ref(h, p["w2"]) * p["s2"][None] + p["b2"][None]
        if "wd" in p:
            r = (jnp.einsum("oc,ncl->nol", p["wd"], x, precision=_HIGHEST)
                 * p["sd"][None] + p["bd"][None])
        else:
            r = x
        x = jnp.maximum(o + r, 0.0)
    return x


# ----------------------------------- main -----------------------------------

if __name__ == "__main__":
    key = jax.random.PRNGKey(0)
    kx, kp = jax.random.split(key)

    # small shapes: batch=4, in_channels=8, hidden_channels=16, L=128
    N, C_IN, HIDDEN, L = 4, 8, 16, 128
    x = jax.random.normal(kx, (N, C_IN, L), jnp.float32)
    length = jnp.array([L, L - 16, L - 32, L], jnp.int32)

    packed, raw, retract = build_resnet1d_params(
        kp, block_num=2, in_channels=C_IN, hidden_channels=HIDDEN,
        stride=1, expansion=1)

    out, out_len = resnet1d_forward(x, packed, length=length,
                                    length_retract=retract)
    out = jax.block_until_ready(out)
    out_len = jax.block_until_ready(out_len)

    assert out.shape == (N, HIDDEN, L)

    # Check vs. the pure-f32 PyTorch-semantics reference (both sides f32,
    # HIGHEST-precision matmuls; only summation-order differences remain).
    ref_f32 = _forward_ref_raw(x, raw)
    assert jnp.allclose(out, ref_f32, atol=1e-2, rtol=1e-2), \
        "mismatch vs f32 reference"

    assert jnp.array_equal(out_len, (length / retract).astype(jnp.int32))

    print("KERNEL_OK")
</pallas_src>

<mosaic_0001>
module attributes {stable_mosaic.version = 11 : i64} {
  func.func @_fused_resnet_kernel(%arg0: i32, %arg1: memref<8x256xf32, #tpu.memory_space<vmem>>, %arg2: memref<16x24xf32, #tpu.memory_space<vmem>>, %arg3: memref<16x1xf32, #tpu.memory_space<vmem>>, %arg4: memref<16x48xf32, #tpu.memory_space<vmem>>, %arg5: memref<16x1xf32, #tpu.memory_space<vmem>>, %arg6: memref<16x8xf32, #tpu.memory_space<vmem>>, %arg7: memref<16x1xf32, #tpu.memory_space<vmem>>, %arg8: memref<7x16x48xf32, #tpu.memory_space<vmem>>, %arg9: memref<7x16x1xf32, #tpu.memory_space<vmem>>, %arg10: memref<7x16x48xf32, #tpu.memory_space<vmem>>, %arg11: memref<7x16x1xf32, #tpu.memory_space<vmem>>, %arg12: memref<16x256xf32, #tpu.memory_space<vmem>>) attributes {dimension_semantics = [#tpu.dimension_semantics<parallel>], iteration_bounds = array<i64: 2>, scalar_prefetch = 0 : i64, scratch_operands = 0 : i64, tpu.core_type = #tpu.core_type<tc>, window_params = [{transform_indices = @transform_0, window_bounds = array<i64: 8, 256>}, {pipeline_mode = #tpu.pipeline_mode<synchronous>, transform_indices = @transform_1, window_bounds = array<i64: 16, 24>}, {pipeline_mode = #tpu.pipeline_mode<synchronous>, transform_indices = @transform_2, window_bounds = array<i64: 16, 1>}, {pipeline_mode = #tpu.pipeline_mode<synchronous>, transform_indices = @transform_3, window_bounds = array<i64: 16, 48>}, {pipeline_mode = #tpu.pipeline_mode<synchronous>, transform_indices = @transform_4, window_bounds = array<i64: 16, 1>}, {pipeline_mode = #tpu.pipeline_mode<synchronous>, transform_indices = @transform_5, window_bounds = array<i64: 16, 8>}, {pipeline_mode = #tpu.pipeline_mode<synchronous>, transform_indices = @transform_6, window_bounds = array<i64: 16, 1>}, {pipeline_mode = #tpu.pipeline_mode<synchronous>, transform_indices = @transform_7, window_bounds = array<i64: 7, 16, 48>}, {pipeline_mode = #tpu.pipeline_mode<synchronous>, transform_indices = @transform_8, window_bounds = array<i64: 7, 16, 1>}, {pipeline_mode = #tpu.pipeline_mode<synchronous>, transform_indices = @transform_9, window_bounds = array<i64: 7, 16, 48>}, {pipeline_mode = #tpu.pipeline_mode<synchronous>, transform_indices = @transform_10, window_bounds = array<i64: 7, 16, 1>}, {transform_indices = @transform_11, window_bounds = array<i64: 16, 256>}]} {
    %c0 = arith.constant 0 : index
    %c0_0 = arith.constant 0 : index
    %0 = vector.load %arg1[%c0, %c0_0] : memref<8x256xf32, #tpu.memory_space<vmem>>, vector<8x256xf32>
    %1 = tpu.iota {dimensions = array<i32: 1>} : vector<1x256xi32>
    %c128_i32 = arith.constant 128 : i32
    %c0_i32 = arith.constant 0 : i32
    %2 = arith.cmpi eq, %c128_i32, %c0_i32 : i32
    %c1_i32 = arith.constant 1 : i32
    %3 = arith.select %2, %c1_i32, %c128_i32 : i32
    %4 = vector.broadcast %3 : i32 to vector<1x256xi32>
    %5 = arith.remsi %1, %4 : vector<1x256xi32>
    %c0_i32_1 = arith.constant 0 : i32
    %6 = vector.broadcast %c0_i32_1 : i32 to vector<1x256xi32>
    %7 = arith.cmpi ne, %5, %6 : vector<1x256xi32>
    %c0_i32_2 = arith.constant 0 : i32
    %8 = vector.broadcast %c0_i32_2 : i32 to vector<1x256xi32>
    %9 = arith.cmpi slt, %5, %8 : vector<1x256xi32>
    %c0_i32_3 = arith.constant 0 : i32
    %10 = arith.cmpi slt, %3, %c0_i32_3 : i32
    %11 = vector.broadcast %10 : i1 to vector<1x256xi1>
    %12 = vector.broadcast %11 : vector<1x256xi1> to vector<1x256xi1>
    %13 = arith.xori %9, %12 : vector<1x256xi1>
    %14 = arith.andi %13, %7 : vector<1x256xi1>
    %15 = vector.broadcast %3 : i32 to vector<1x256xi32>
    %16 = arith.addi %5, %15 : vector<1x256xi32>
    %17 = arith.select %14, %16, %5 : vector<1x256xi1>, vector<1x256xi32>
    %c0_i32_4 = arith.constant 0 : i32
    %18 = vector.broadcast %c0_i32_4 : i32 to vector<1x256xi32>
    %19 = arith.cmpi ne, %17, %18 : vector<1x256xi32>
    %20 = arith.extui %19 : vector<1x256xi1> to vector<1x256xi32>
    %21 = arith.sitofp %20 : vector<1x256xi32> to vector<1x256xf32>
    %c127_i32 = arith.constant 127 : i32
    %22 = vector.broadcast %c127_i32 : i32 to vector<1x256xi32>
    %23 = arith.cmpi ne, %17, %22 : vector<1x256xi32>
    %24 = arith.extui %23 : vector<1x256xi1> to vector<1x256xi32>
    %25 = arith.sitofp %24 : vector<1x256xi32> to vector<1x256xf32>
    %c0_5 = arith.constant 0 : index
    %c0_6 = arith.constant 0 : index
    %26 = vector.load %arg2[%c0_5, %c0_6] : memref<16x24xf32, #tpu.memory_space<vmem>>, vector<16x24xf32>
    %c0_7 = arith.constant 0 : index
    %c0_8 = arith.constant 0 : index
    %27 = vector.load %arg3[%c0_7, %c0_8] : memref<16x1xf32, #tpu.memory_space<vmem>>, vector<16x1xf32>
    %c1_i32_9 = arith.constant 1 : i32
    %28 = tpu.dynamic_rotate %0 by %c1_i32_9 dim 1 : vector<8x256xf32>, i32 -> vector<8x256xf32>
    %29 = vector.broadcast %21 : vector<1x256xf32> to vector<8x256xf32>
    %30 = arith.mulf %28, %29 : vector<8x256xf32>
    %c255_i32 = arith.constant 255 : i32
    %31 = tpu.dynamic_rotate %0 by %c255_i32 dim 1 : vector<8x256xf32>, i32 -> vector<8x256xf32>
    %32 = vector.broadcast %25 : vector<1x256xf32> to vector<8x256xf32>
    %33 = arith.mulf %31, %32 : vector<8x256xf32>
    %34 = tpu.concatenate %30, %0, %33 in 0 : vector<8x256xf32>, vector<8x256xf32>, vector<8x256xf32> -> vector<24x256xf32>
    %cst = arith.constant dense<0.000000e+00> : vector<16x256xf32>
    %35 = tpu.matmul %26, %34, %cst {dimension_numbers = #tpu.dot_dimension_numbers<[1], [0], [0], [1], [0, 0, 1, 1], [], []>, precision = #tpu.contract_precision<fp32>} : vector<16x24xf32>, vector<24x256xf32>, vector<16x256xf32> -> vector<16x256xf32>
    %36 = vector.broadcast %27 : vector<16x1xf32> to vector<16x256xf32>
    %37 = arith.addf %35, %36 : vector<16x256xf32>
    %cst_10 = arith.constant 0.000000e+00 : f32
    %38 = vector.broadcast %cst_10 : f32 to vector<16x256xf32>
    %39 = arith.maximumf %37, %38 : vector<16x256xf32>
    %c0_11 = arith.constant 0 : index
    %c0_12 = arith.constant 0 : index
    %40 = vector.load %arg4[%c0_11, %c0_12] : memref<16x48xf32, #tpu.memory_space<vmem>>, vector<16x48xf32>
    %c0_13 = arith.constant 0 : index
    %c0_14 = arith.constant 0 : index
    %41 = vector.load %arg5[%c0_13, %c0_14] : memref<16x1xf32, #tpu.memory_space<vmem>>, vector<16x1xf32>
    %c1_i32_15 = arith.constant 1 : i32
    %42 = tpu.dynamic_rotate %39 by %c1_i32_15 dim 1 : vector<16x256xf32>, i32 -> vector<16x256xf32>
    %43 = vector.broadcast %21 : vector<1x256xf32> to vector<16x256xf32>
    %44 = arith.mulf %42, %43 : vector<16x256xf32>
    %c255_i32_16 = arith.constant 255 : i32
    %45 = tpu.dynamic_rotate %39 by %c255_i32_16 dim 1 : vector<16x256xf32>, i32 -> vector<16x256xf32>
    %46 = vector.broadcast %25 : vector<1x256xf32> to vector<16x256xf32>
    %47 = arith.mulf %45, %46 : vector<16x256xf32>
    %48 = tpu.concatenate %44, %39, %47 in 0 : vector<16x256xf32>, vector<16x256xf32>, vector<16x256xf32> -> vector<48x256xf32>
    %cst_17 = arith.constant dense<0.000000e+00> : vector<16x256xf32>
    %49 = tpu.matmul %40, %48, %cst_17 {dimension_numbers = #tpu.dot_dimension_numbers<[1], [0], [0], [1], [0, 0, 1, 1], [], []>, precision = #tpu.contract_precision<fp32>} : vector<16x48xf32>, vector<48x256xf32>, vector<16x256xf32> -> vector<16x256xf32>
    %50 = vector.broadcast %41 : vector<16x1xf32> to vector<16x256xf32>
    %51 = arith.addf %49, %50 : vector<16x256xf32>
    %c0_18 = arith.constant 0 : index
    %c0_19 = arith.constant 0 : index
    %52 = vector.load %arg6[%c0_18, %c0_19] : memref<16x8xf32, #tpu.memory_space<vmem>>, vector<16x8xf32>
    %cst_20 = arith.constant dense<0.000000e+00> : vector<16x256xf32>
    %53 = tpu.matmul %52, %0, %cst_20 {dimension_numbers = #tpu.dot_dimension_numbers<[1], [0], [0], [1], [0, 0, 1, 1], [], []>, precision = #tpu.contract_precision<fp32>} : vector<16x8xf32>, vector<8x256xf32>, vector<16x256xf32> -> vector<16x256xf32>
    %c0_21 = arith.constant 0 : index
    %c0_22 = arith.constant 0 : index
    %54 = vector.load %arg7[%c0_21, %c0_22] : memref<16x1xf32, #tpu.memory_space<vmem>>, vector<16x1xf32>
    %55 = vector.broadcast %54 : vector<16x1xf32> to vector<16x256xf32>
    %56 = arith.addf %53, %55 : vector<16x256xf32>
    %57 = arith.addf %51, %56 : vector<16x256xf32>
    %cst_23 = arith.constant 0.000000e+00 : f32
    %58 = vector.broadcast %cst_23 : f32 to vector<16x256xf32>
    %59 = arith.maximumf %57, %58 : vector<16x256xf32>
    %c0_i32_24 = arith.constant 0 : i32
    %c7_i32 = arith.constant 7 : i32
    %60 = arith.addi %c0_i32_24, %c7_i32 : i32
    %c1_i32_25 = arith.constant 1 : i32
    %61 = scf.for %arg13 = %c0_i32_24 to %60 step %c1_i32_25 iter_args(%arg14 = %59) -> (vector<16x256xf32>)  : i32 {
      %63 = arith.index_cast %arg13 : i32 to index
      %c0_29 = arith.constant 0 : index
      %c0_30 = arith.constant 0 : index
      %64 = vector.load %arg8[%63, %c0_29, %c0_30] : memref<7x16x48xf32, #tpu.memory_space<vmem>>, vector<1x16x48xf32>
      %65 = vector.shape_cast %64 : vector<1x16x48xf32> to vector<16x48xf32>
      %66 = arith.index_cast %arg13 : i32 to index
      %c0_31 = arith.constant 0 : index
      %c0_32 = arith.constant 0 : index
      %67 = vector.load %arg9[%66, %c0_31, %c0_32] : memref<7x16x1xf32, #tpu.memory_space<vmem>>, vector<1x16x1xf32>
      %68 = vector.shape_cast %67 : vector<1x16x1xf32> to vector<16x1xf32>
      %c1_i32_33 = arith.constant 1 : i32
      %69 = tpu.dynamic_rotate %arg14 by %c1_i32_33 dim 1 : vector<16x256xf32>, i32 -> vector<16x256xf32>
      %70 = vector.broadcast %21 : vector<1x256xf32> to vector<16x256xf32>
      %71 = arith.mulf %69, %70 : vector<16x256xf32>
      %c255_i32_34 = arith.constant 255 : i32
      %72 = tpu.dynamic_rotate %arg14 by %c255_i32_34 dim 1 : vector<16x256xf32>, i32 -> vector<16x256xf32>
      %73 = vector.broadcast %25 : vector<1x256xf32> to vector<16x256xf32>
      %74 = arith.mulf %72, %73 : vector<16x256xf32>
      %75 = tpu.concatenate %71, %arg14, %74 in 0 : vector<16x256xf32>, vector<16x256xf32>, vector<16x256xf32> -> vector<48x256xf32>
      %cst_35 = arith.constant dense<0.000000e+00> : vector<16x256xf32>
      %76 = tpu.matmul %65, %75, %cst_35 {dimension_numbers = #tpu.dot_dimension_numbers<[1], [0], [0], [1], [0, 0, 1, 1], [], []>, precision = #tpu.contract_precision<fp32>} : vector<16x48xf32>, vector<48x256xf32>, vector<16x256xf32> -> vector<16x256xf32>
      %77 = vector.broadcast %68 : vector<16x1xf32> to vector<16x256xf32>
      %78 = arith.addf %76, %77 : vector<16x256xf32>
      %cst_36 = arith.constant 0.000000e+00 : f32
      %79 = vector.broadcast %cst_36 : f32 to vector<16x256xf32>
      %80 = arith.maximumf %78, %79 : vector<16x256xf32>
      %81 = arith.index_cast %arg13 : i32 to index
      %c0_37 = arith.constant 0 : index
      %c0_38 = arith.constant 0 : index
      %82 = vector.load %arg10[%81, %c0_37, %c0_38] : memref<7x16x48xf32, #tpu.memory_space<vmem>>, vector<1x16x48xf32>
      %83 = vector.shape_cast %82 : vector<1x16x48xf32> to vector<16x48xf32>
      %84 = arith.index_cast %arg13 : i32 to index
      %c0_39 = arith.constant 0 : index
      %c0_40 = arith.constant 0 : index
      %85 = vector.load %arg11[%84, %c0_39, %c0_40] : memref<7x16x1xf32, #tpu.memory_space<vmem>>, vector<1x16x1xf32>
      %86 = vector.shape_cast %85 : vector<1x16x1xf32> to vector<16x1xf32>
      %c1_i32_41 = arith.constant 1 : i32
      %87 = tpu.dynamic_rotate %80 by %c1_i32_41 dim 1 : vector<16x256xf32>, i32 -> vector<16x256xf32>
      %88 = vector.broadcast %21 : vector<1x256xf32> to vector<16x256xf32>
      %89 = arith.mulf %87, %88 : vector<16x256xf32>
      %c255_i32_42 = arith.constant 255 : i32
      %90 = tpu.dynamic_rotate %80 by %c255_i32_42 dim 1 : vector<16x256xf32>, i32 -> vector<16x256xf32>
      %91 = vector.broadcast %25 : vector<1x256xf32> to vector<16x256xf32>
      %92 = arith.mulf %90, %91 : vector<16x256xf32>
      %93 = tpu.concatenate %89, %80, %92 in 0 : vector<16x256xf32>, vector<16x256xf32>, vector<16x256xf32> -> vector<48x256xf32>
      %cst_43 = arith.constant dense<0.000000e+00> : vector<16x256xf32>
      %94 = tpu.matmul %83, %93, %cst_43 {dimension_numbers = #tpu.dot_dimension_numbers<[1], [0], [0], [1], [0, 0, 1, 1], [], []>, precision = #tpu.contract_precision<fp32>} : vector<16x48xf32>, vector<48x256xf32>, vector<16x256xf32> -> vector<16x256xf32>
      %95 = vector.broadcast %86 : vector<16x1xf32> to vector<16x256xf32>
      %96 = arith.addf %94, %95 : vector<16x256xf32>
      %97 = arith.addf %96, %arg14 : vector<16x256xf32>
      %cst_44 = arith.constant 0.000000e+00 : f32
      %98 = vector.broadcast %cst_44 : f32 to vector<16x256xf32>
      %99 = arith.maximumf %97, %98 : vector<16x256xf32>
      scf.yield %99 : vector<16x256xf32>
    }
    %c7_i32_26 = arith.constant 7 : i32
    %c0_27 = arith.constant 0 : index
    %c0_28 = arith.constant 0 : index
    %62 = vector.load %arg12[%c0_27, %c0_28] : memref<16x256xf32, #tpu.memory_space<vmem>>, vector<16x256xf32>
    tpu.vector_store %arg12[%c0_27, %c0_28], %61 {strides = array<i32>} : memref<16x256xf32, #tpu.memory_space<vmem>>, vector<16x256xf32>,
    return
  }
  func.func @transform_0(%arg0: i32) -> (i32, i32) {
    %c0_i32 = arith.constant 0 : i32
    %c0_i32_0 = arith.constant 0 : i32
    return %c0_i32, %arg0 : i32, i32
  }
  func.func @transform_1(%arg0: i32) -> (i32, i32) {
    %c0_i32 = arith.constant 0 : i32
    %c0_i32_0 = arith.constant 0 : i32
    %c0_i32_1 = arith.constant 0 : i32
    return %c0_i32, %c0_i32_0 : i32, i32
  }
  func.func @transform_2(%arg0: i32) -> (i32, i32) {
    %c0_i32 = arith.constant 0 : i32
    %c0_i32_0 = arith.constant 0 : i32
    %c0_i32_1 = arith.constant 0 : i32
    return %c0_i32, %c0_i32_0 : i32, i32
  }
  func.func @transform_3(%arg0: i32) -> (i32, i32) {
    %c0_i32 = arith.constant 0 : i32
    %c0_i32_0 = arith.constant 0 : i32
    %c0_i32_1 = arith.constant 0 : i32
    return %c0_i32, %c0_i32_0 : i32, i32
  }
  func.func @transform_4(%arg0: i32) -> (i32, i32) {
    %c0_i32 = arith.constant 0 : i32
    %c0_i32_0 = arith.constant 0 : i32
    %c0_i32_1 = arith.constant 0 : i32
    return %c0_i32, %c0_i32_0 : i32, i32
  }
  func.func @transform_5(%arg0: i32) -> (i32, i32) {
    %c0_i32 = arith.constant 0 : i32
    %c0_i32_0 = arith.constant 0 : i32
    %c0_i32_1 = arith.constant 0 : i32
    return %c0_i32, %c0_i32_0 : i32, i32
  }
  func.func @transform_6(%arg0: i32) -> (i32, i32) {
    %c0_i32 = arith.constant 0 : i32
    %c0_i32_0 = arith.constant 0 : i32
    %c0_i32_1 = arith.constant 0 : i32
    return %c0_i32, %c0_i32_0 : i32, i32
  }
  func.func @transform_7(%arg0: i32) -> (i32, i32, i32) {
    %c0_i32 = arith.constant 0 : i32
    %c0_i32_0 = arith.constant 0 : i32
    %c0_i32_1 = arith.constant 0 : i32
    %c0_i32_2 = arith.constant 0 : i32
    return %c0_i32, %c0_i32_0, %c0_i32_1 : i32, i32, i32
  }
  func.func @transform_8(%arg0: i32) -> (i32, i32, i32) {
    %c0_i32 = arith.constant 0 : i32
    %c0_i32_0 = arith.constant 0 : i32
    %c0_i32_1 = arith.constant 0 : i32
    %c0_i32_2 = arith.constant 0 : i32
    return %c0_i32, %c0_i32_0, %c0_i32_1 : i32, i32, i32
  }
  func.func @transform_9(%arg0: i32) -> (i32, i32, i32) {
    %c0_i32 = arith.constant 0 : i32
    %c0_i32_0 = arith.constant 0 : i32
    %c0_i32_1 = arith.constant 0 : i32
    %c0_i32_2 = arith.constant 0 : i32
    return %c0_i32, %c0_i32_0, %c0_i32_1 : i32, i32, i32
  }
  func.func @transform_10(%arg0: i32) -> (i32, i32, i32) {
    %c0_i32 = arith.constant 0 : i32
    %c0_i32_0 = arith.constant 0 : i32
    %c0_i32_1 = arith.constant 0 : i32
    %c0_i32_2 = arith.constant 0 : i32
    return %c0_i32, %c0_i32_0, %c0_i32_1 : i32, i32, i32
  }
  func.func @transform_11(%arg0: i32) -> (i32, i32) {
    %c0_i32 = arith.constant 0 : i32
    %c0_i32_0 = arith.constant 0 : i32
    return %c0_i32, %arg0 : i32, i32
  }
}

</mosaic_0001>

<bundles_post_ra>
// kernel: tpu_custom_call.1
= control target key start
LH: loop header
LB: loop body
LE: loop exit
PB: predicated region body
PF: predicated region fallthrough
CT: control target
= control target key end

     0   :  { %s4405_s0 = inlined_call_operand.vmem [shape: f32[8,512], index: 0, kind: input, shape index: {}]   ;;  %s4406_s1 = inlined_call_operand.vmem [shape: f32[16,24], index: 1, kind: input, shape index: {}]   ;;  %s4407_s2 = inlined_call_operand.vmem [shape: f32[16,1], index: 2, kind: input, shape index: {}]   ;;  %s4408_s3 = inlined_call_operand.vmem [shape: f32[16,48], index: 3, kind: input, shape index: {}]   ;;  %s4409_s4 = inlined_call_operand.vmem [shape: f32[16,1], index: 4, kind: input, shape index: {}]   ;;  %s4410_s5 = inlined_call_operand.vmem [shape: f32[16,8], index: 5, kind: input, shape index: {}]   ;;  %s4411_s6 = inlined_call_operand.vmem [shape: f32[16,1], index: 6, kind: input, shape index: {}]   ;;  %s4412_s7 = inlined_call_operand.vmem [shape: f32[7,16,48], index: 7, kind: input, shape index: {}]   ;;  %s4413_s8 = inlined_call_operand.vmem [shape: f32[7,16,1], index: 8, kind: input, shape index: {}]   ;;  %s4414_s9 = inlined_call_operand.vmem [shape: f32[7,16,48], index: 9, kind: input, shape index: {}]   ;;  %s4415_s10 = inlined_call_operand.vmem [shape: f32[7,16,1], index: 10, kind: input, shape index: {}]   ;;  %s4416_s11 = inlined_call_operand.hbm [shape: f32[16,512], index: 11, kind: output, shape index: {}]  }
   0x1   :  { %4418 = sst [smem:[#allocation5_spill]] %s4405_s0 }
   0x2   :  { %4419 = sst [smem:[#allocation6_spill]] %s4406_s1 }
   0x3   :  { %16 = vsyncpa [#allocation3], 0 }
   0x4   :  { %18 = vsyncpa [#allocation3 + $0x1], 0  ;;  %s3291_s17 = smov 0   ;;  %s3293_s18 = smov 0  }
   0x5   :  { %s3295_s19 = smov 0   ;;  %s3297_s20 = smov 0  }
   0x6 LB: > { %s3312_s21 = sadd.s32 4294967295, %s3199_s20   ;;  %s3004_s22 = sadd.s32 4294967294, %s3199_s20   ;;  %s3199_s20 = sphi %s3297_s20, %s4432_s20   ;;  %s3195_s19 = sphi %s3295_s19, %s4431_s19   ;;  %s3191_s18 = sphi %s3293_s18, %s4430_s18   ;;  %s3187_s17 = sphi %s3291_s17, %s4429_s17  }
   0x7   : > { %s3316_s23 = sadd.s32 1, %s3199_s20   ;;  %s267_s24 = sadd.s32 1, %s3195_s19 }
   0x8   : > { %s264_s25 = ssub.s32 %s3199_s20, %s3316_s23  ;;  %p277_p0 = scmp.ne.s32.totalorder %s3195_s19, %s3191_s18 }
   0x9   : > { %p265_p1 = scmp.eq.s32.totalorder %s264_s25, 0  ;;  %p278_p2 = scmp.eq.s32.totalorder %s3312_s21, 1 }
   0xa   : > { %p283_p3 = scmp.ne.s32.totalorder %s3191_s18, %s3187_s17  ;;  %p284_p4 = scmp.eq.s32.totalorder %s3004_s22, 1 }
   0xb   : > { %s3327_s26 = scalar_select %p265_p1, %s3195_s19, %s267_s24  }
   0xc   : > { %p3329_p5 = por %p278_p2, %p277_p0  ;;  %p3333_p6 = por %p284_p4, %p283_p3 }
   0xd   : > { %p3007_p7 = scmp.ge.s32.totalorder %s3199_s20, 1  ;;  %p341_p8 = scmp.lt.s32.totalorder %s3199_s20, 3 }
   0xf   : > { %p342_p9 = pnand %p3007_p7, %p341_p8 }
  0x10   : > { %s3009_s29 = sshll.u32 (!%p342_p9), %s3312_s21, 1  ;;  %s4422_s0 = sld [smem:[#allocation5_spill]] (!%p342_p9) }
  0x11   : > { %345 = sbr.rel (%p342_p9) target bundleno = 1366 (0x556), region = 64  ;;  %p382_p10 = scmp.lt.s32.totalorder (!%p342_p9), %s3009_s29, 3 }
  0x12   : > { %s3221_s15 = smov (!%p342_p9), 1   ;;  %s3222_s16 = smov (!%p342_p9), 127  }
  0x13   : > { %s4417_s22 = sand.u32 (!%p342_p9), 1, %s3191_s18   ;;  %s4423_s1 = sld [smem:[#allocation6_spill]] (!%p342_p9) }
  0x14   : > { %s3348_s24 = sshll.u32 (!%p342_p9), %s4417_s22, 5  ;;  %s3798_s12 = smov (!%p342_p9), 0  }
  0x16   : > { %s4434_s29 = smov (!%p382_p10, %s3009_s29), 3  ;;  %v390_v2 = vlaneseq  ;;  %vm461_vm0 = vcmask 195584   ;;  %v3223_v16 = vmov 0.0   ;;  %vm924_vm7 = vcmask 392192  }
  0x17   : > { %s3010_s30 = sshll.u32 %s4434_s29, 3  ;;  %vm1429_vm8 = vcmask 64512  }
  0x18   : > { %s385_s14 = scalar_lea.vmem %s4422_s0, %s3010_s30  ;;  %v3352_v3 = vand.u32 127, %v390_v2  ;;  %s3788_s30 = scalar_lea.vmem [#allocation2], %s3348_s24 }
  0x19   : > { %v388_v0 = vld [vmem:[%s385_s14] sm:$0xff]  ;;  %v389_v1 = vld [vmem:[%s385_s14 + $0x8] sm:$0xff] }
  0x1a   : > { %433 = vrot.lane.b32.xlu1 %v388_v0, %s3221_s15  ;;  %442 = vrot.lane.b32.xlu0 %v388_v0, %s3222_s16  ;;  %v429_v4 = vld [vmem:[%s4423_s1] sm:$0xff]  ;;  %v392_v5 = vadd.s32 128, %v3352_v3  ;;  %v3360_v11 = vand.u32 4294901760, %v388_v0  ;;  %v430_v12 = vld [vmem:[%s4423_s1 + $0x8] sm:$0xff]  ;;  %vm417_vm1 = vcmp.ne.s32.totalorder %v3352_v3, 0  ;;  %v3369_v14 = vand.u32 4294901760, %v389_v1 }
  0x1b   : > { %v463_v6 = vsel %vm461_vm0, %v429_v4, 0  ;;  %vm423_vm3 = vcmp.ne.s32.totalorder %v3352_v3, 127  ;;  %v466_v15 = vsel %vm461_vm0, %v430_v12, 0  ;;  %v3372_v17 = vsel %vm417_vm1, 1.0, %v3223_v16  ;;  %v432_v4 = vld [vmem:[%s4407_s2 + $0x8] sm:$0xff] }
  0x1c   : > { %v404_v7 = vand.u32 127, %v392_v5  ;;  %v3358_v8 = vand.u32 4294901760, %v463_v6  ;;  %vm437_vm5 = vcmp.lt.s32.totalorder %v3352_v3, 1  ;;  %vm446_vm6 = vcmp.lt.s32.totalorder %v3352_v3, 127 }
  0x1d   : > { %v3378_v19 = vsel %vm423_vm3, 1.0, %v3223_v16  ;;  %v3383_v21 = vsub.f32 %v388_v0, %v3360_v11  ;;  %v3389_v23 = vsub.f32 %v389_v1, %v3369_v14  ;;  %v3391_v26 = vand.u32 4294901760, %v466_v15 }
  0x1e   : > { %vm418_vm2 = vcmp.ne.s32.totalorder %v404_v7, 0  ;;  %v3367_v13 = vsub.f32 %v463_v6, %v3358_v8  ;;  %vm424_vm4 = vcmp.ne.s32.totalorder %v404_v7, 127  ;;  %v3224_v5 = vmov 0   ;;  %v431_v6 = vld [vmem:[%s4407_s2] sm:$0xff] }
  0x1f   : > { %v3374_v18 = vsel %vm418_vm2, 1.0, %v3223_v16  ;;  %v3380_v20 = vsel %vm424_vm4, 1.0, %v3223_v16  ;;  %v3408_v36 = vand.u32 4294901760, %v3383_v21  ;;  %v3417_v41 = vand.u32 4294901760, %v3389_v23  ;;  %3111 = vset.pattern.permute.xlu2 %v3224_v5  ;;  %3112 = vset.pattern.permute.xlu0 %v3224_v5 }
  0x20   : > { %v3386_v22 = vand.u32 4294901760, %v3367_v13  ;;  %v3420_v42 = vsub.f32 %v466_v15, %v3391_v26  ;;  %458 = vperm.xlu2 %3111, %v432_v4   ;;  %3113 = vset.pattern.permute.xlu1 %v3224_v5 }
  0x21   : > { %v526_v50 = vsub.f32 %v3383_v21, %v3408_v36  ;;  %v729_v52 = vsub.f32 %v3389_v23, %v3417_v41 }
  0x22   : > { %435 = vrot.lane.b32.xlu1 %v389_v1, %s3221_s15  ;;  %444 = vrot.lane.b32.xlu0 %v389_v1, %s3222_s16  ;;  %v490_v35 = vsub.f32 %v3367_v13, %v3386_v22  ;;  %v3434_v54 = vand.u32 4294901760, %v3420_v42 }
  0x23   : > { %v3440_v59 = vand.u32 4294901760, %v526_v50  ;;  %v3443_v60 = vand.u32 4294901760, %v729_v52 }
  0x24   : > { %v3424_v46 = vand.u32 4294901760, %v490_v35  ;;  %v498_v63 = vsub.f32 %v3420_v42, %v3434_v54 }
  0x26   : > { %v499_v2 = vand.u32 4294901760, %v498_v63 }
  0x28   : > { %453 = vperm.xlu2 %3111, %v431_v6  }
  0x7a   : > { %v459_v7 = vpop.permute.xlu2 %458 }
  0x8c   : > { %v434_v9 = vpop.permute.xlu1 %433  ;;  %v443_v10 = vpop.permute.xlu0 %442 }
  0x94   : > { %v436_v24 = vpop.permute.xlu1 %435  ;;  %v445_v25 = vpop.permute.xlu0 %444 }
  0x95   : > { %v438_v27 = vsel %vm437_vm5, %v434_v9, %v436_v24  ;;  %v439_v28 = vsel %vm437_vm5, %v436_v24, %v434_v9  ;;  %v447_v29 = vsel %vm446_vm6, %v443_v10, %v445_v25  ;;  %v448_v30 = vsel %vm446_vm6, %v445_v25, %v443_v10  ;;  %v454_v10 = vpop.permute.xlu2 %453 }
  0x96   : > { %v440_v31 = vmul.f32 %v3372_v17, %v439_v28  ;;  %v441_v32 = vmul.f32 %v3374_v18, %v438_v27  ;;  %v449_v33 = vmul.f32 %v3378_v19, %v447_v29  ;;  %v450_v34 = vmul.f32 %v3380_v20, %v448_v30 }
  0x98   : > { %v3410_v37 = vand.u32 4294901760, %v440_v31  ;;  %v3412_v38 = vand.u32 4294901760, %v441_v32  ;;  %v481_v39 = vand.u32 4294901760, %v449_v33  ;;  %v3414_v40 = vand.u32 4294901760, %v450_v34 }
  0x9a   : > { %v733_v43 = vsub.f32 %v441_v32, %v3412_v38  ;;  %v721_v44 = vsub.f32 %v450_v34, %v3414_v40  ;;  %482 = vmatpush.msra.mxu0 %v481_v39  ;;  %591 = vmatpush.msra.mxu3 %v481_v39  ;;  %v518_v45 = vsub.f32 %v449_v33, %v481_v39 }
  0x9b   : > { %v530_v47 = vsub.f32 %v440_v31, %v3410_v37 }
  0x9c   : > { %484 = vmatpush.msra.mxu0 %v3360_v11  ;;  %559 = vmatpush.msra.mxu2 %v518_v45  ;;  %v519_v48 = vand.u32 4294901760, %v518_v45  ;;  %v722_v49 = vand.u32 4294901760, %v721_v44  ;;  %v734_v53 = vand.u32 4294901760, %v733_v43 }
  0x9d   : > { %593 = vmatpush.msra.mxu3 %v3360_v11  ;;  %v531_v51 = vand.u32 4294901760, %v530_v47 }
  0x9e   : > { %486 = vmatpush.msra.mxu0 %v3410_v37  ;;  %562 = vmatpush.msra.mxu2 %v3383_v21  ;;  %v520_v55 = vsub.f32 %v518_v45, %v519_v48  ;;  %v723_v56 = vsub.f32 %v721_v44, %v722_v49  ;;  %v735_v62 = vsub.f32 %v733_v43, %v734_v53 }
  0x9f   : > { %595 = vmatpush.msra.mxu3 %v3410_v37  ;;  %492 = vmatmul.f32.vlgmr.msra.gmra.mxu0 %v3424_v46  ;;  %v532_v61 = vsub.f32 %v530_v47, %v531_v51 }
  0xa0   : > { %625 = vmatpush.msrb.mxu0 %v519_v48  ;;  %565 = vmatpush.msra.mxu2 %v530_v47  ;;  %v521_v57 = vand.u32 4294901760, %v520_v55  ;;  %v724_v58 = vand.u32 4294901760, %v723_v56  ;;  %v736_v1 = vand.u32 4294901760, %v735_v62 }
  0xa1   : > { %599 = vmatmul.f32.vlgmr.msra.gmra.mxu3 %v3386_v22  ;;  %568 = vmatmul.f32.vlgmr.msra.gmra.mxu2 %v3367_v13  ;;  %v533_v0 = vand.u32 4294901760, %v532_v61 }
  0xa2   : > { %685 = vmatpush.msrb.mxu2 %v3414_v40  ;;  %629 = vmatpush.msrb.mxu0 %v3408_v36 }
  0xa3   : > { %522 = vmatpush.msra.mxu1 %v521_v57  ;;  %725 = vmatpush.msrb.mxu3 %v724_v58 }
  0xa4   : > { %633 = vmatpush.msrb.mxu0 %v531_v51  ;;  %687 = vmatpush.msrb.mxu2 %v3369_v14 }
  0xa5   : > { %528 = vmatpush.msra.mxu1 %v3440_v59  ;;  %731 = vmatpush.msrb.mxu3 %v3443_v60 }
  0xa6   : > { %762 = vmatpush.msra.mxu0 %v721_v44  ;;  %689 = vmatpush.msrb.mxu2 %v3412_v38 }
  0xa7   : > { %534 = vmatpush.msra.mxu1 %v533_v0  ;;  %737 = vmatpush.msrb.mxu3 %v736_v1 }
  0xa8   : > { %765 = vmatpush.msra.mxu0 %v3389_v23  ;;  %828 = vmatpush.msra.mxu2 %v722_v49 }
  0xa9   : > { %500 = vmatmul.f32.gmra.mxu0 %v499_v2  ;;  %536 = vmatmul.f32.vlgmr.msra.gmra.mxu1 %v3358_v8 }
  0xaa   : > { %657 = vmatpush.msrb.mxu1 %v481_v39  ;;  %860 = vmatpush.msra.mxu3 %v3414_v40 }
  0xab   : > { %768 = vmatpush.msra.mxu0 %v733_v43  ;;  %832 = vmatpush.msra.mxu2 %v3417_v41 }
  0xac   : > { %659 = vmatpush.msrb.mxu1 %v3360_v11  ;;  %862 = vmatpush.msra.mxu3 %v3369_v14 }
  0xad   : > { %836 = vmatpush.msra.mxu2 %v734_v53  ;;  %605 = vmatmul.f32.gmra.mxu3 %v3434_v54 }
  0xae   : > { %573 = vmatmul.f32.gmra.mxu2 %v3420_v42  ;;  %661 = vmatpush.msrb.mxu1 %v3410_v37 }
  0xaf   : > { %864 = vmatpush.msra.mxu3 %v3412_v38 }
  0xb0   : > { %794 = vmatpush.msra.mxu1 %v3414_v40 }
  0xb1   : > { %635 = vmatmul.f32.vlgmr.msrb.gmra.mxu0 %v3358_v8  ;;  %540 = vmatmul.f32.gmra.mxu1 %v3391_v26 }
  0xb2   : > { %796 = vmatpush.msra.mxu1 %v3369_v14 }
  0xb4   : > { %798 = vmatpush.msra.mxu1 %v3412_v38 }
  0xb5   : > { %739 = vmatmul.f32.vlgmr.msrb.gmra.mxu3 %v3358_v8 }
  0xb6   : > { %695 = vmatmul.f32.vlgmr.msrb.gmra.mxu2 %v3424_v46 }
  0xb9   : > { %639 = vmatmul.f32.gmra.mxu0 %v3391_v26  ;;  %663 = vmatmul.f32.vlgmr.msrb.gmra.mxu1 %v3358_v8 }
  0xbd   : > { %743 = vmatmul.f32.gmra.mxu3 %v3391_v26 }
  0xbe   : > { %703 = vmatmul.f32.gmra.mxu2 %v499_v2 }
  0xc1   : > { %771 = vmatmul.f32.vlgmr.msra.gmra.mxu0 %v3367_v13  ;;  %667 = vmatmul.f32.gmra.mxu1 %v3391_v26 }
  0xc5   : > { %866 = vmatmul.f32.vlgmr.msra.gmra.mxu3 %v3358_v8 }
  0xc6   : > { %838 = vmatmul.f32.vlgmr.msra.gmra.mxu2 %v3358_v8 }
  0xc9   : > { %776 = vmatmul.f32.gmra.mxu0 %v3420_v42  ;;  %802 = vmatmul.f32.vlgmr.msra.gmra.mxu1 %v3386_v22 }
  0xcd   : > { %870 = vmatmul.f32.gmra.mxu3 %v3391_v26 }
  0xce   : > { %842 = vmatmul.f32.gmra.mxu2 %v3391_v26 }
  0xd1   : > { %808 = vmatmul.f32.gmra.mxu1 %v3434_v54 }
 0x11c   : > { %v493_v9 = vpop.f32.mrf.mxu0 }
 0x11d   : > { %v494_v24 = vadd.f32 %v493_v9, %v454_v10 }
 0x124   : > { %v600_v12 = vpop.f32.mrf.mxu3  ;;  %v569_v16 = vpop.f32.mrf.mxu2 }
 0x126   : > { %v501_v13 = vpop.f32.mrf.mxu0  ;;  %v537_v15 = vpop.f32.mrf.mxu1 }
 0x127   : > { %v538_v25 = vadd.f32 %v537_v15, %v494_v24  ;;  %v502_v28 = vadd.f32 %v501_v13, %v459_v7  ;;  %v1418_v13 = vld [vmem:[%s4411_s6 + $0x8] sm:$0xff] }
 0x129   : > { %v570_v29 = vadd.f32 %v569_v16, %v538_v25 }
 0x12b   : > { %v601_v31 = vadd.f32 %v600_v12, %v570_v29  ;;  %v880_v12 = vld [vmem:[%s4409_s4] sm:$0xff] }
 0x12e   : > { %v636_v8 = vpop.f32.mrf.mxu0  ;;  %v541_v27 = vpop.f32.mrf.mxu1 }
 0x12f   : > { %v542_v32 = vadd.f32 %v541_v27, %v502_v28  ;;  %v637_v26 = vadd.f32 %v636_v8, %v601_v31  ;;  %v878_v28 = vld [vmem:[%s4408_s3] sm:$0xff] }
 0x130   : > { %v606_v22 = vpop.f32.mrf.mxu3  ;;  %v926_v31 = vsel %vm924_vm7, %v878_v28, 0 }
 0x131   : > { %v574_v30 = vpop.f32.mrf.mxu2 }
 0x132   : > { %v575_v35 = vadd.f32 %v574_v30, %v542_v32 }
 0x134   : > { %v607_v42 = vadd.f32 %v606_v22, %v575_v35 }
 0x136   : > { %v640_v33 = vpop.f32.mrf.mxu0  ;;  %v664_v34 = vpop.f32.mrf.mxu1 }
 0x137   : > { %v665_v37 = vadd.f32 %v664_v34, %v637_v26  ;;  %v641_v43 = vadd.f32 %v640_v33, %v607_v42 }
 0x138   : > { %v740_v38 = vpop.f32.mrf.mxu3 }
 0x139   : > { %v696_v39 = vpop.f32.mrf.mxu2  ;;  %v874_v40 = vmax.f32 %v665_v37, 0.0 }
 0x13a   : > { %v697_v45 = vadd.f32 %v696_v39, %v454_v10  ;;  %v3538_v39 = vand.u32 4294901760, %v926_v31 }
 0x13b   : > { %898 = vrot.lane.b32.xlu2 %v874_v40, %s3222_s16  ;;  %v3519_v29 = vand.u32 4294901760, %v874_v40 }
 0x13c   : > { %v741_v51 = vadd.f32 %v740_v38, %v697_v45 }
 0x13d   : > { %v3536_v38 = vsub.f32 %v874_v40, %v3519_v29 }
 0x13e   : > { %v668_v44 = vpop.f32.mrf.mxu1  ;;  %v772_v48 = vpop.f32.mrf.mxu0 }
 0x13f   : > { %v669_v46 = vadd.f32 %v668_v44, %v641_v43  ;;  %v773_v52 = vadd.f32 %v772_v48, %v741_v51  ;;  %v1000_v48 = vand.u32 4294901760, %v3536_v38 }
 0x140   : > { %v744_v47 = vpop.f32.mrf.mxu3 }
 0x141   : > { %v704_v49 = vpop.f32.mrf.mxu2  ;;  %v876_v50 = vmax.f32 %v669_v46, 0.0  ;;  %v879_v46 = vld [vmem:[%s4408_s3 + $0x8] sm:$0xff] }
 0x142   : > { %v705_v54 = vadd.f32 %v704_v49, %v459_v7  ;;  %v3559_v49 = vsub.f32 %v926_v31, %v3538_v39 }
 0x143   : > { %900 = vrot.lane.b32.xlu0 %v876_v50, %s3222_s16  ;;  %v3521_v30 = vand.u32 4294901760, %v876_v50 }
 0x144   : > { %v745_v62 = vadd.f32 %v744_v47, %v705_v54  ;;  %v929_v54 = vsel %vm924_vm7, %v879_v46, 0 }
 0x145   : > { %v3543_v43 = vsub.f32 %v876_v50, %v3521_v30 }
 0x146   : > { %v803_v53 = vpop.f32.mrf.mxu1  ;;  %v777_v61 = vpop.f32.mrf.mxu0 }
 0x147   : > { %v804_v55 = vadd.f32 %v803_v53, %v773_v52  ;;  %v778_v0 = vadd.f32 %v777_v61, %v745_v62  ;;  %v994_v53 = vand.u32 4294901760, %v3543_v43 }
 0x148   : > { %v867_v56 = vpop.f32.mrf.mxu3 }
 0x149   : > { %v839_v57 = vpop.f32.mrf.mxu2 }
 0x14a   : > { %v840_v58 = vadd.f32 %v839_v57, %v804_v55 }
 0x14c   : > { %v868_v63 = vadd.f32 %v867_v56, %v840_v58 }
 0x14e   : > { %v3491_v1 = vmax.f32 %v868_v63, 0.0  ;;  %v809_v2 = vpop.f32.mrf.mxu1 }
 0x14f   : > { %v810_v4 = vadd.f32 %v809_v2, %v778_v0  ;;  %v1001_v2 = vsub.f32 %v3536_v38, %v1000_v48 }
 0x150   : > { %902 = vrot.lane.b32.xlu0 %v3491_v1, %s3222_s16  ;;  %v871_v6 = vpop.f32.mrf.mxu3 }
 0x151   : > { %v843_v5 = vpop.f32.mrf.mxu2 }
 0x152   : > { %v844_v9 = vadd.f32 %v843_v5, %v810_v4  ;;  %v3593_v4 = vand.u32 4294901760, %v3559_v49  ;;  %v3595_v5 = vand.u32 4294901760, %v929_v54 }
 0x154   : > { %v872_v10 = vadd.f32 %v871_v6, %v844_v9 }
 0x156   : > { %v3495_v7 = vmax.f32 %v872_v10, 0.0 }
 0x158   : > { %904 = vrot.lane.b32.xlu1 %v3495_v7, %s3222_s16  ;;  %882 = vrot.lane.b32.xlu0 %v874_v40, %s3221_s15  ;;  %v3586_v0 = vand.u32 4294901760, %v3495_v7 }
 0x159   : > { %888 = vrot.lane.b32.xlu2 %v3495_v7, %s3221_s15 }
 0x15a   : > { %v3623_v28 = vsub.f32 %v3495_v7, %v3586_v0 }
 0x160   : > { %884 = vrot.lane.b32.xlu1 %v876_v50, %s3221_s15 }
 0x161   : > { %916 = vperm.xlu2 %3111, %v880_v12   ;;  %v995_v12 = vsub.f32 %v3543_v43, %v994_v53 }
 0x168   : > { %886 = vrot.lane.b32.xlu1 %v3491_v1, %s3221_s15 }
 0x169   : > { %1426 = vperm.xlu2 %3111, %v1418_v13   ;;  %v3606_v13 = vand.u32 4294901760, %v3491_v1 }
 0x195   : > { %v899_v16 = vpop.permute.xlu2 %898 }
 0x1b3   : > { %v889_v50 = vpop.permute.xlu2 %888 }
 0x1b5   : > { %v901_v15 = vpop.permute.xlu0 %900 }
 0x1c2   : > { %v903_v24 = vpop.permute.xlu0 %902 }
 0x1c3   : > { %v906_v25 = vsel %vm446_vm6, %v899_v16, %v903_v24  ;;  %v908_v34 = vsel %vm446_vm6, %v903_v24, %v899_v16 }
 0x1c4   : > { %v910_v8 = vmul.f32 %v3378_v19, %v906_v25  ;;  %v911_v44 = vmul.f32 %v3380_v20, %v908_v34  ;;  %v996_v34 = vand.u32 4294901760, %v995_v12 }
 0x1c6   : > { %v3514_v27 = vand.u32 4294901760, %v910_v8  ;;  %v3566_v55 = vand.u32 4294901760, %v911_v44 }
 0x1c8   : > { %v3529_v33 = vsub.f32 %v910_v8, %v3514_v27  ;;  %v956_v8 = vsub.f32 %v3559_v49, %v3593_v4 }
 0x1ca   : > { %v905_v22 = vpop.permute.xlu1 %904  ;;  %v988_v45 = vand.u32 4294901760, %v3529_v33  ;;  %v883_v31 = vpop.permute.xlu0 %882 }
 0x1cb   : > { %v907_v32 = vsel %vm446_vm6, %v901_v15, %v905_v22  ;;  %v909_v26 = vsel %vm446_vm6, %v905_v22, %v901_v15  ;;  %v3609_v15 = vsub.f32 %v911_v44, %v3566_v55  ;;  %v3626_v22 = vsub.f32 %v929_v54, %v3595_v5 }
 0x1cc   : > { %v912_v35 = vmul.f32 %v3378_v19, %v907_v32  ;;  %v913_v37 = vmul.f32 %v3380_v20, %v909_v26  ;;  %v989_v58 = vsub.f32 %v3529_v33, %v988_v45 }
 0x1cd   : > { %v1230_v7 = vand.u32 4294901760, %v3609_v15 }
 0x1ce   : > { %v3540_v42 = vand.u32 4294901760, %v912_v35  ;;  %v3553_v40 = vand.u32 4294901760, %v913_v37  ;;  %v990_v24 = vand.u32 4294901760, %v989_v58  ;;  %v3647_v58 = vand.u32 4294901760, %v956_v8 }
 0x1d0   : > { %v3551_v47 = vsub.f32 %v912_v35, %v3540_v42  ;;  %942 = vmatpush.msrb.mxu0 %v3540_v42  ;;  %1075 = vmatpush.msrb.mxu3 %v3540_v42  ;;  %v3577_v61 = vsub.f32 %v913_v37, %v3553_v40  ;;  %v1002_v35 = vand.u32 4294901760, %v1001_v2 }
 0x1d2   : > { %v982_v51 = vand.u32 4294901760, %v3551_v47  ;;  %v885_v52 = vpop.permute.xlu1 %884  ;;  %944 = vmatpush.msrb.mxu0 %v3514_v27  ;;  %1037 = vmatpush.msrb.mxu2 %v3551_v47  ;;  %v1224_v16 = vand.u32 4294901760, %v3577_v61 }
 0x1d3   : > { %v891_v56 = vsel %vm437_vm5, %v885_v52, %v889_v50  ;;  %v893_v57 = vsel %vm437_vm5, %v889_v50, %v885_v52  ;;  %1077 = vmatpush.msrb.mxu3 %v3514_v27  ;;  %v3639_v50 = vsub.f32 %v3491_v1, %v3606_v13 }
 0x1d4   : > { %v896_v62 = vmul.f32 %v3372_v17, %v893_v57  ;;  %946 = vmatpush.msrb.mxu0 %v3521_v30  ;;  %1040 = vmatpush.msrb.mxu2 %v3529_v33  ;;  %v983_v63 = vsub.f32 %v3551_v47, %v982_v51  ;;  %v897_v6 = vmul.f32 %v3374_v18, %v891_v56  ;;  %v881_v47 = vld [vmem:[%s4409_s4 + $0x8] sm:$0xff] }
 0x1d5   : > { %1079 = vmatpush.msrb.mxu3 %v3521_v30  ;;  %v1225_v57 = vsub.f32 %v3577_v61, %v1224_v16  ;;  %921 = vperm.xlu0 %3112, %v881_v47  }
 0x1d6   : > { %v3598_v9 = vand.u32 4294901760, %v896_v62  ;;  %948 = vmatpush.msrb.mxu0 %v3519_v29  ;;  %1043 = vmatpush.msrb.mxu2 %v3543_v43  ;;  %v984_v10 = vand.u32 4294901760, %v983_v63  ;;  %v3628_v32 = vand.u32 4294901760, %v897_v6  ;;  %v3651_v63 = vand.u32 4294901760, %v3626_v22 }
 0x1d7   : > { %1081 = vmatpush.msrb.mxu3 %v3519_v29  ;;  %v1226_v8 = vand.u32 4294901760, %v1225_v57 }
 0x1d8   : > { %950 = vmatpush.msrb.mxu0 %v3598_v9  ;;  %985 = vmatpush.msrb.mxu1 %v984_v10  ;;  %v3615_v25 = vsub.f32 %v896_v62, %v3598_v9  ;;  %v1236_v62 = vand.u32 4294901760, %v3623_v28  ;;  %v3654_v1 = vsub.f32 %v897_v6, %v3628_v32 }
 0x1d9   : > { %1046 = vmatpush.msrb.mxu2 %v3536_v38  ;;  %1083 = vmatpush.msrb.mxu3 %v3598_v9 }
 0x1da   : > { %v887_v26 = vpop.permute.xlu1 %886  ;;  %991 = vmatpush.msrb.mxu1 %v990_v24  ;;  %v1006_v37 = vand.u32 4294901760, %v3615_v25  ;;  %v1231_v24 = vsub.f32 %v3609_v15, %v1230_v7 }
 0x1db   : > { %v890_v44 = vsel %vm437_vm5, %v883_v31, %v887_v26  ;;  %v892_v46 = vsel %vm437_vm5, %v887_v26, %v883_v31  ;;  %1049 = vmatpush.msrb.mxu2 %v3615_v25  ;;  %v1237_v26 = vsub.f32 %v3623_v28, %v1236_v62 }
 0x1dc   : > { %v894_v52 = vmul.f32 %v3372_v17, %v892_v46  ;;  %v895_v54 = vmul.f32 %v3374_v18, %v890_v44  ;;  %997 = vmatpush.msrb.mxu1 %v996_v34  ;;  %v1007_v56 = vsub.f32 %v3615_v25, %v1006_v37  ;;  %v1242_v25 = vand.u32 4294901760, %v3639_v50 }
 0x1dd   : > { %v1248_v44 = vand.u32 4294901760, %v3654_v1  ;;  %v1232_v46 = vand.u32 4294901760, %v1231_v24 }
 0x1de   : > { %v3656_v2 = vand.u32 4294901760, %v894_v52  ;;  %v3658_v10 = vand.u32 4294901760, %v895_v54  ;;  %1003 = vmatpush.msrb.mxu1 %v1002_v35  ;;  %v1008_v12 = vand.u32 4294901760, %v1007_v56  ;;  %v964_v35 = vsub.f32 %v3626_v22, %v3651_v63 }
 0x1df   : > { %v1249_v24 = vsub.f32 %v3654_v1, %v1248_v44 }
 0x1e0   : > { %952 = vmatpush.msrb.mxu0 %v3656_v2  ;;  %1009 = vmatpush.msrb.mxu1 %v1008_v12  ;;  %v1011_v31 = vsub.f32 %v894_v52, %v3656_v2  ;;  %v3667_v6 = vsub.f32 %v895_v54, %v3658_v10  ;;  %v1243_v52 = vsub.f32 %v3639_v50, %v1242_v25  ;;  %v1238_v54 = vand.u32 4294901760, %v1237_v26 }
 0x1e1   : > { %1085 = vmatpush.msrb.mxu3 %v3656_v2  ;;  %958 = vmatmul.f32.vlgmr.msrb.gmra.mxu0 %v3647_v58  ;;  %v965_v12 = vand.u32 4294901760, %v964_v35 }
 0x1e2   : > { %1112 = vmatpush.msra.mxu0 %v982_v51  ;;  %v1012_v34 = vand.u32 4294901760, %v1011_v31  ;;  %1052 = vmatpush.msrb.mxu2 %v1011_v31  ;;  %v1254_v56 = vand.u32 4294901760, %v3667_v6  ;;  %v1244_v33 = vand.u32 4294901760, %v1243_v52 }
 0x1e3   : > { %1227 = vmatpush.msra.mxu3 %v1226_v8  ;;  %1055 = vmatmul.f32.vlgmr.msrb.gmra.mxu2 %v3559_v49 }
 0x1e4   : > { %1089 = vmatmul.f32.vlgmr.msrb.gmra.mxu3 %v3593_v4  ;;  %1116 = vmatpush.msra.mxu0 %v988_v45  ;;  %v1013_v51 = vsub.f32 %v1011_v31, %v1012_v34  ;;  %v1255_v43 = vsub.f32 %v3667_v6, %v1254_v56  ;;  %v1250_v45 = vand.u32 4294901760, %v1249_v24 }
 0x1e5   : > { %1184 = vmatpush.msra.mxu2 %v3553_v40  ;;  %1233 = vmatpush.msra.mxu3 %v1232_v46 }
 0x1e6   : > { %1120 = vmatpush.msra.mxu0 %v994_v53  ;;  %v1014_v57 = vand.u32 4294901760, %v1013_v51  ;;  %v1256_v38 = vand.u32 4294901760, %v1255_v43 }
 0x1e7   : > { %1186 = vmatpush.msra.mxu2 %v3566_v55  ;;  %1239 = vmatpush.msra.mxu3 %v1238_v54 }
 0x1e8   : > { %1124 = vmatpush.msra.mxu0 %v1000_v48  ;;  %1015 = vmatpush.msrb.mxu1 %v1014_v57  ;;  %v1417_v48 = vld [vmem:[%s4411_s6] sm:$0xff] }
 0x1e9   : > { %1188 = vmatpush.msra.mxu2 %v3586_v0  ;;  %1245 = vmatpush.msra.mxu3 %v1244_v33 }
 0x1ea   : > { %966 = vmatmul.f32.gmra.mxu0 %v965_v12  ;;  %1017 = vmatmul.f32.vlgmr.msrb.gmra.mxu1 %v3538_v39 }
 0x1eb   : > { %1128 = vmatpush.msra.mxu0 %v1006_v37  ;;  %1153 = vmatpush.msra.mxu1 %v3540_v42  ;;  %v1416_v42 = vld [vmem:[%s4410_s5 + $0x8] sm:$0xff] }
 0x1ec   : > { %1190 = vmatpush.msra.mxu2 %v3606_v13  ;;  %1251 = vmatpush.msra.mxu3 %v1250_v45 }
 0x1ed   : > { %1060 = vmatmul.f32.gmra.mxu2 %v3626_v22  ;;  %1132 = vmatpush.msra.mxu0 %v1012_v34 }
 0x1ee   : > { %1155 = vmatpush.msra.mxu1 %v3514_v27  ;;  %1192 = vmatpush.msra.mxu2 %v3628_v32  ;;  %v1415_v27 = vld [vmem:[%s4410_s5] sm:$0xff] }
 0x1ef   : > { %1257 = vmatpush.msra.mxu3 %v1256_v38  ;;  %1279 = vmatpush.msrb.mxu0 %v3577_v61 }
 0x1f0   : > { %1157 = vmatpush.msra.mxu1 %v3521_v30  ;;  %1095 = vmatmul.f32.gmra.mxu3 %v3651_v63 }
 0x1f1   : > { %1395 = vmatpush.msrb.mxu3 %v3553_v40  ;;  %1194 = vmatpush.msra.mxu2 %v3658_v10 }
 0x1f2   : > { %1282 = vmatpush.msrb.mxu0 %v3609_v15  ;;  %1159 = vmatpush.msra.mxu1 %v3519_v29  ;;  %v1431_v29 = vsel %vm1429_vm8, %v1415_v27, 0 }
 0x1f3   : > { %1354 = vmatpush.msrb.mxu2 %v1224_v16  ;;  %1397 = vmatpush.msrb.mxu3 %v3566_v55  ;;  %v1453_v30 = vand.u32 4294901760, %v1431_v29 }
 0x1f4   : > { %1285 = vmatpush.msrb.mxu0 %v3623_v28  ;;  %1021 = vmatmul.f32.gmra.mxu1 %v3595_v5 }
 0x1f5   : > { %1358 = vmatpush.msrb.mxu2 %v1230_v7  ;;  %1399 = vmatpush.msrb.mxu3 %v3586_v0 }
 0x1f6   : > { %1134 = vmatmul.f32.vlgmr.msra.gmra.mxu0 %v3538_v39  ;;  %1161 = vmatpush.msra.mxu1 %v3598_v9 }
 0x1f7   : > { %1288 = vmatpush.msrb.mxu0 %v3639_v50  ;;  %1362 = vmatpush.msrb.mxu2 %v1236_v62 }
 0x1f8   : > { %1401 = vmatpush.msrb.mxu3 %v3606_v13  ;;  %1163 = vmatpush.msra.mxu1 %v3656_v2 }
 0x1f9   : > { %1200 = vmatmul.f32.vlgmr.msra.gmra.mxu2 %v3647_v58  ;;  %1291 = vmatpush.msrb.mxu0 %v3654_v1 }
 0x1fa   : > { %1317 = vmatpush.msrb.mxu1 %v3553_v40  ;;  %1366 = vmatpush.msrb.mxu2 %v1242_v25  ;;  %v1434_v40 = vsel %vm1429_vm8, %v1416_v42, 0 }
 0x1fb   : > { %1403 = vmatpush.msrb.mxu3 %v3628_v32  ;;  %1294 = vmatpush.msrb.mxu0 %v3667_v6 }
 0x1fc   : > { %1259 = vmatmul.f32.vlgmr.msra.gmra.mxu3 %v3538_v39  ;;  %1319 = vmatpush.msrb.mxu1 %v3566_v55 }
 0x1fd   : > { %1370 = vmatpush.msrb.mxu2 %v1248_v44  ;;  %1405 = vmatpush.msrb.mxu3 %v3658_v10 }
 0x1fe   : > { %1321 = vmatpush.msrb.mxu1 %v3586_v0  ;;  %1138 = vmatmul.f32.gmra.mxu0 %v3595_v5 }
 0x1ff   : > { %1374 = vmatpush.msrb.mxu2 %v1254_v56  ;;  %1165 = vmatmul.f32.vlgmr.msra.gmra.mxu1 %v3538_v39 }
 0x200   : > { %1323 = vmatpush.msrb.mxu1 %v3606_v13  ;;  %1452 = vmatpush.msra.mxu0 %v3360_v11 }
 0x201   : > { %1517 = vmatpush.msra.mxu2 %v3383_v21  ;;  %1545 = vmatpush.msra.mxu3 %v3360_v11  ;;  %v1454_v21 = vsub.f32 %v1431_v29, %v1453_v30 }
 0x202   : > { %1208 = vmatmul.f32.gmra.mxu2 %v965_v12  ;;  %1325 = vmatpush.msrb.mxu1 %v3628_v32 }
 0x203   : > { %1421 = vperm.xlu1 %3113, %v1417_v48   ;;  %v1455_v53 = vand.u32 4294901760, %v1454_v21 }
 0x204   : > { %1263 = vmatmul.f32.gmra.mxu3 %v3595_v5  ;;  %1327 = vmatpush.msrb.mxu1 %v3658_v10 }
 0x206   : > { %1490 = vmatpush.msra.mxu1 %v3440_v59  ;;  %1297 = vmatmul.f32.vlgmr.msrb.gmra.mxu0 %v3559_v49  ;;  %v1461_v59 = vand.u32 4294901760, %v1434_v40 }
 0x207   : > { %1169 = vmatmul.f32.gmra.mxu1 %v3595_v5  ;;  %1577 = vmatpush.msrb.mxu0 %v3408_v36  ;;  %v1456_v36 = vsub.f32 %v1454_v21, %v1455_v53 }
 0x208   : > { %v1462_v49 = vsub.f32 %v1434_v40, %v1461_v59 }
 0x209   : > { %v1457_v55 = vand.u32 4294901760, %v1456_v36 }
 0x20a   : > { %1376 = vmatmul.f32.vlgmr.msrb.gmra.mxu2 %v3538_v39  ;;  %v1463_v61 = vand.u32 4294901760, %v1462_v49 }
 0x20b   : > { %1629 = vmatpush.msrb.mxu2 %v3369_v14 }
 0x20c   : > { %1407 = vmatmul.f32.vlgmr.msrb.gmra.mxu3 %v3538_v39  ;;  %v1464_v0 = vsub.f32 %v1462_v49, %v1463_v61 }
 0x20d   : > { %1667 = vmatpush.msrb.mxu3 %v3443_v60 }
 0x20e   : > { %1302 = vmatmul.f32.gmra.mxu0 %v3626_v22  ;;  %v1465_v60 = vand.u32 4294901760, %v1464_v0 }
 0x20f   : > { %1331 = vmatmul.f32.vlgmr.msrb.gmra.mxu1 %v3593_v4 }
 0x210   : > { %1603 = vmatpush.msrb.mxu1 %v3360_v11 }
 0x212   : > { %1380 = vmatmul.f32.gmra.mxu2 %v3595_v5 }
 0x214   : > { %1411 = vmatmul.f32.gmra.mxu3 %v3595_v5 }
 0x216   : > { %1458 = vmatmul.f32.vlgmr.msra.gmra.mxu0 %v1457_v55 }
 0x217   : > { %1337 = vmatmul.f32.gmra.mxu1 %v3651_v63  ;;  %1694 = vmatpush.msra.mxu0 %v3389_v23 }
 0x21a   : > { %1520 = vmatmul.f32.vlgmr.msra.gmra.mxu2 %v1454_v21 }
 0x21b   : > { %1754 = vmatpush.msra.mxu2 %v3417_v41 }
 0x21c   : > { %1549 = vmatmul.f32.vlgmr.msra.gmra.mxu3 %v1455_v53 }
 0x21d   : > { %1780 = vmatpush.msra.mxu3 %v3369_v14 }
 0x21e   : > { %1466 = vmatmul.f32.gmra.mxu0 %v1465_v60 }
 0x21f   : > { %1492 = vmatmul.f32.vlgmr.msra.gmra.mxu1 %v1453_v30 }
 0x220   : > { %1722 = vmatpush.msra.mxu1 %v3369_v14  ;;  %v917_v14 = vpop.permute.xlu2 %916 }
 0x222   : > { %1525 = vmatmul.f32.gmra.mxu2 %v1462_v49 }
 0x224   : > { %1555 = vmatmul.f32.gmra.mxu3 %v1463_v61 }
 0x226   : > { %1579 = vmatmul.f32.vlgmr.msrb.gmra.mxu0 %v1453_v30 }
 0x227   : > { %1496 = vmatmul.f32.gmra.mxu1 %v1461_v59 }
 0x22a   : > { %1635 = vmatmul.f32.vlgmr.msrb.gmra.mxu2 %v1457_v55 }
 0x22c   : > { %1669 = vmatmul.f32.vlgmr.msrb.gmra.mxu3 %v1453_v30 }
 0x22e   : > { %1583 = vmatmul.f32.gmra.mxu0 %v1461_v59 }
 0x22f   : > { %1605 = vmatmul.f32.vlgmr.msrb.gmra.mxu1 %v1453_v30 }
 0x232   : > { %1643 = vmatmul.f32.gmra.mxu2 %v1465_v60 }
 0x234   : > { %1673 = vmatmul.f32.gmra.mxu3 %v1461_v59 }
 0x236   : > { %1697 = vmatmul.f32.vlgmr.msra.gmra.mxu0 %v1454_v21 }
 0x237   : > { %1609 = vmatmul.f32.gmra.mxu1 %v1461_v59 }
 0x23a   : > { %1756 = vmatmul.f32.vlgmr.msra.gmra.mxu2 %v1453_v30 }
 0x23c   : > { %1782 = vmatmul.f32.vlgmr.msra.gmra.mxu3 %v1453_v30 }
 0x23e   : > { %1702 = vmatmul.f32.gmra.mxu0 %v1462_v49 }
 0x23f   : > { %1726 = vmatmul.f32.vlgmr.msra.gmra.mxu1 %v1455_v53 }
 0x242   : > { %1760 = vmatmul.f32.gmra.mxu2 %v1461_v59 }
 0x244   : > { %1786 = vmatmul.f32.gmra.mxu3 %v1461_v59  ;;  %v1427_v59 = vpop.permute.xlu2 %1426 }
 0x247   : > { %1732 = vmatmul.f32.gmra.mxu1 %v1463_v61  ;;  %v3780_v16 = vpop.permute.xlu0 %921 }
 0x25e   : > { %v959_v11 = vpop.f32.mrf.mxu0 }
 0x25f   : > { %v960_v23 = vadd.f32 %v959_v11, %v917_v14 }
 0x266   : > { %v1056_v4 = vpop.f32.mrf.mxu2 }
 0x267   : > { %v1018_v41 = vpop.f32.mrf.mxu1  ;;  %v967_v5 = vpop.f32.mrf.mxu0 }
 0x268   : > { %v1019_v39 = vadd.f32 %v1018_v41, %v960_v23  ;;  %v1090_v13 = vpop.f32.mrf.mxu3  ;;  %v968_v28 = vadd.f32 %v967_v5, %v3780_v16 }
 0x26a   : > { %v1057_v9 = vadd.f32 %v1056_v4, %v1019_v39 }
 0x26c   : > { %v1091_v15 = vadd.f32 %v1090_v13, %v1057_v9 }
 0x270   : > { %v1061_v32 = vpop.f32.mrf.mxu2 }
 0x271   : > { %v1022_v22 = vpop.f32.mrf.mxu1 }
 0x272   : > { %v1023_v37 = vadd.f32 %v1022_v22, %v968_v28 }
 0x273   : > { %v1135_v7 = vpop.f32.mrf.mxu0  ;;  %v1096_v62 = vpop.f32.mrf.mxu3 }
 0x274   : > { %v1136_v50 = vadd.f32 %v1135_v7, %v1091_v15  ;;  %v1062_v58 = vadd.f32 %v1061_v32, %v1023_v37 }
 0x275   : > { %v1422_v43 = vpop.permute.xlu1 %1421 }
 0x276   : > { %v1097_v63 = vadd.f32 %v1096_v62, %v1062_v58 }
 0x27b   : > { %v1139_v1 = vpop.f32.mrf.mxu0 }
 0x27c   : > { %v1140_v2 = vadd.f32 %v1139_v1, %v1097_v63  ;;  %v1166_v10 = vpop.f32.mrf.mxu1  ;;  %v1201_v25 = vpop.f32.mrf.mxu2 }
 0x27d   : > { %v1167_v8 = vadd.f32 %v1166_v10, %v1136_v50  ;;  %v1202_v31 = vadd.f32 %v1201_v25, %v917_v14 }
 0x27f   : > { %v1260_v6 = vpop.f32.mrf.mxu3 }
 0x280   : > { %v1261_v26 = vadd.f32 %v1260_v6, %v1202_v31 }
 0x283   : > { %v1298_v34 = vpop.f32.mrf.mxu0 }
 0x284   : > { %v1170_v35 = vpop.f32.mrf.mxu1  ;;  %v1299_v7 = vadd.f32 %v1298_v34, %v1261_v26 }
 0x285   : > { %v1209_v44 = vpop.f32.mrf.mxu2  ;;  %v1171_v46 = vadd.f32 %v1170_v35, %v1140_v2 }
 0x286   : > { %v1210_v62 = vadd.f32 %v1209_v44, %v3780_v16 }
 0x287   : > { %v1264_v52 = vpop.f32.mrf.mxu3 }
 0x288   : > { %v1265_v31 = vadd.f32 %v1264_v52, %v1210_v62 }
 0x28b   : > { %v1303_v47 = vpop.f32.mrf.mxu0 }
 0x28c   : > { %v1332_v51 = vpop.f32.mrf.mxu1 }
 0x28d   : > { %v1377_v54 = vpop.f32.mrf.mxu2  ;;  %v1333_v63 = vadd.f32 %v1332_v51, %v1299_v7 }
 0x28f   : > { %v1408_v56 = vpop.f32.mrf.mxu3  ;;  %v1378_v6 = vadd.f32 %v1377_v54, %v1333_v63 }
 0x293   : > { %v1459_v57 = vpop.f32.mrf.mxu0 }
 0x294   : > { %v1338_v12 = vpop.f32.mrf.mxu1  ;;  %v1460_v29 = vadd.f32 %v1459_v57, %v1422_v43 }
 0x295   : > { %v1381_v24 = vpop.f32.mrf.mxu2 }
 0x297   : > { %v3783_v33 = vpop.f32.mrf.mxu3 }
 0x29b   : > { %v1467_v45 = vpop.f32.mrf.mxu0 }
 0x29c   : > { %v1493_v38 = vpop.f32.mrf.mxu1  ;;  %v1468_v36 = vadd.f32 %v1467_v45, %v1427_v59  ;;  %v1304_v45 = vadd.f32 %v1303_v47, %v1265_v31 }
 0x29d   : > { %v1521_v27 = vpop.f32.mrf.mxu2  ;;  %v1494_v42 = vadd.f32 %v1493_v38, %v1460_v29  ;;  %v1409_v29 = vadd.f32 %v1408_v56, %v1378_v6 }
 0x29e   : > { %v1339_v26 = vadd.f32 %v1338_v12, %v1304_v45 }
 0x29f   : > { %v1550_v30 = vpop.f32.mrf.mxu3  ;;  %v1522_v53 = vadd.f32 %v1521_v27, %v1494_v42 }
 0x2a0   : > { %v1382_v42 = vadd.f32 %v1381_v24, %v1339_v26 }
 0x2a1   : > { %v1551_v55 = vadd.f32 %v1550_v30, %v1522_v53 }
 0x2a3   : > { %v1580_v21 = vpop.f32.mrf.mxu0 }
 0x2a4   : > { %v1497_v40 = vpop.f32.mrf.mxu1  ;;  %v1581_v0 = vadd.f32 %v1580_v21, %v1551_v55 }
 0x2a5   : > { %v1526_v48 = vpop.f32.mrf.mxu2  ;;  %v1498_v61 = vadd.f32 %v1497_v40, %v1468_v36 }
 0x2a7   : > { %v1556_v49 = vpop.f32.mrf.mxu3  ;;  %v1527_v23 = vadd.f32 %v1526_v48, %v1498_v61  ;;  %v1413_v48 = vadd.f32 %v3783_v33, %v1382_v42 }
 0x2a9   : > { %v1557_v5 = vadd.f32 %v1556_v49, %v1527_v23 }
 0x2ab   : > { %v1584_v60 = vpop.f32.mrf.mxu0 }
 0x2ac   : > { %v1606_v11 = vpop.f32.mrf.mxu1  ;;  %v1585_v13 = vadd.f32 %v1584_v60, %v1557_v5 }
 0x2ad   : > { %v1636_v14 = vpop.f32.mrf.mxu2  ;;  %v1607_v41 = vadd.f32 %v1606_v11, %v1581_v0 }
 0x2ae   : > { %v1637_v22 = vadd.f32 %v1636_v14, %v1422_v43 }
 0x2af   : > { %v1790_v39 = vadd.f32 %v1607_v41, %v1167_v8  ;;  %v1670_v4 = vpop.f32.mrf.mxu3 }
 0x2b0   : > { %v1671_v1 = vadd.f32 %v1670_v4, %v1637_v22 }
 0x2b1   : > { %v1794_v9 = vmax.f32 %v1790_v39, 0.0  }
 0x2b3   : > { %v1698_v37 = vpop.f32.mrf.mxu0 }
 0x2b4   : > { %v1610_v15 = vpop.f32.mrf.mxu1  ;;  %v1699_v10 = vadd.f32 %v1698_v37, %v1671_v1 }
 0x2b5   : > { %v1644_v28 = vpop.f32.mrf.mxu2  ;;  %v1611_v32 = vadd.f32 %v1610_v15, %v1585_v13 }
 0x2b6   : > { %v1645_v35 = vadd.f32 %v1644_v28, %v1427_v59 }
 0x2b7   : > { %v1792_v50 = vadd.f32 %v1611_v32, %v1171_v46  ;;  %v1674_v58 = vpop.f32.mrf.mxu3 }
 0x2b8   : > { %v1675_v34 = vadd.f32 %v1674_v58, %v1645_v35 }
 0x2b9   : > { %v1796_v2 = vmax.f32 %v1792_v50, 0.0  }
 0x2bb   : > { %v1703_v27 = vpop.f32.mrf.mxu0 }
 0x2bc   : > { %v1727_v25 = vpop.f32.mrf.mxu1  ;;  %v1704_v16 = vadd.f32 %v1703_v27, %v1675_v34 }
 0x2bd   : > { %v1757_v8 = vpop.f32.mrf.mxu2  ;;  %v1728_v57 = vadd.f32 %v1727_v25, %v1699_v10 }
 0x2bf   : > { %v1758_v38 = vadd.f32 %v1757_v8, %v1728_v57  ;;  %v1783_v43 = vpop.f32.mrf.mxu3 }
 0x2c1   : > { %v1784_v46 = vadd.f32 %v1783_v43, %v1758_v38 }
 0x2c3   : > { %v1791_v44 = vadd.f32 %v1784_v46, %v1409_v29 }
 0x2c4   : > { %v1733_v51 = vpop.f32.mrf.mxu1 }
 0x2c5   : > { %v1761_v30 = vpop.f32.mrf.mxu2  ;;  %v1795_v21 = vmax.f32 %v1791_v44, 0.0   ;;  %v1734_v40 = vadd.f32 %v1733_v51, %v1704_v16 }
 0x2c7   : > { %v1762_v52 = vadd.f32 %v1761_v30, %v1734_v40  ;;  %v1787_v54 = vpop.f32.mrf.mxu3 }
 0x2c9   : > { %v1788_v47 = vadd.f32 %v1787_v54, %v1762_v52 }
 0x2cb   : > { %v1793_v53 = vadd.f32 %v1788_v47, %v1413_v48 }
 0x2cd   : > { %v1797_v59 = vmax.f32 %v1793_v53, 0.0  }
 0x2ce LB: >> { %s3225_s24 = smov 127   ;;  %s3226_s13 = smov 1   ;;  %v3848_v11 = vand.u32 4294901760, %v3207_v2  ;;  %v3851_v14 = vand.u32 4294901760, %v3215_v9  ;;  %v3854_v23 = vand.u32 4294901760, %v3203_v59  ;;  %v3893_v35 = vand.u32 4294901760, %v3211_v21  ;;  %s3219_s12 = sphi %s3798_s12, %s1803_s12   ;;  %v3215_v9 = vphi %v1794_v9, %v4427_v9   ;;  %v3211_v21 = vphi %v1795_v21, %v4426_v21   ;;  %v3207_v2 = vphi %v1796_v2, %v4425_v2   ;;  %v3203_v59 = vphi %v1797_v59, %v4424_v59  }
 0x2cf   : >> { %1831 = vrot.lane.b32.xlu1 %v3215_v9, %s3225_s24  ;;  %1833 = vrot.lane.b32.xlu0 %v3207_v2, %s3225_s24  ;;  %s3832_s14 = sshll.u32 %s3219_s12, 4  ;;  %v3227_v16 = vmov 0   ;;  %s1803_s12 = sadd.s32 1, %s3219_s12  }
 0x2d0   : >> { %1817 = vrot.lane.b32.xlu2 %v3207_v2, %s3226_s13  ;;  %s1809_s15 = scalar_lea.vmem %s4412_s7, %s3832_s14  ;;  %v3877_v63 = vsub.f32 %v3207_v2, %v3848_v11  ;;  %v3881_v1 = vsub.f32 %v3215_v9, %v3851_v14  ;;  %s3904_s25 = scalar_lea.vmem %s4413_s8, %s3832_s14  ;;  %3115 = vset.pattern.permute.xlu0 %v3227_v16  ;;  %v3933_v52 = vsub.f32 %v3203_v59, %v3854_v23 }
 0x2d1   : >> { %v1810_v12 = vld [vmem:[%s1809_s15] sm:$0xff]  ;;  %v1811_v13 = vld [vmem:[%s1809_s15 + $0x8] sm:$0xff]  ;;  %3114 = vset.pattern.permute.xlu2 %v3227_v16  ;;  %3116 = vset.pattern.permute.xlu1 %v3227_v16  ;;  %s4099_s16 = scalar_lea.vmem %s4415_s10, %s3832_s14  ;;  %s4106_s0 = scalar_lea.vmem %s4414_s9, %s3832_s14 }
 0x2d2   : >> { %v1858_v24 = vsel %vm924_vm7, %v1810_v12, 0  ;;  %v1861_v10 = vsel %vm924_vm7, %v1811_v13, 0  ;;  %v1926_v34 = vand.u32 4294901760, %v3877_v63  ;;  %v1932_v40 = vand.u32 4294901760, %v3881_v1  ;;  %v1813_v54 = vld [vmem:[%s3904_s25] sm:$0xff]  ;;  %p1800_p11 = scmp.ge.s32.totalorder %s1803_s12, 7  }
 0x2d3   : >> { %v3839_v49 = vand.u32 4294901760, %v1858_v24  ;;  %v3924_v46 = vand.u32 4294901760, %v1861_v10  ;;  %s2914_s14 = sshll.u32 (%p1800_p11), %s3788_s30, 4  ;;  %s4428_s15 = sand.u32 (%p1800_p11), 1, %s3191_s18   ;;  %s2915_s14 = int_to_ptr.vmem [resolvable:$true] %s2914_s14 }
 0x2d4   : > { %s2902_s29 = scalar_lea.sflag (%p1800_p11), [#allocation3], %s4428_s15  ;;  %s3137_s22 = scalar_lea.hbm (%p1800_p11), %s4416_s11, 64 }
 0x2d5   : >> { %v3844_v0 = vsub.f32 %v1858_v24, %v3839_v49 }
 0x2d7   : >> { %1835 = vrot.lane.b32.xlu1 %v3211_v21, %s3225_s24  ;;  %1837 = vrot.lane.b32.xlu0 %v3203_v59, %s3225_s24  ;;  %v3859_v5 = vand.u32 4294901760, %v3844_v0 }
 0x2d8   : >> { %1821 = vrot.lane.b32.xlu2 %v3203_v59, %s3226_s13 }
 0x2d9   : >> { %v1888_v45 = vsub.f32 %v3844_v0, %v3859_v5 }
 0x2df   : >> { %1819 = vrot.lane.b32.xlu1 %v3211_v21, %s3226_s13  ;;  %1815 = vrot.lane.b32.xlu0 %v3215_v9, %s3226_s13 }
 0x2e7   : >> { %1849 = vperm.xlu0 %3115, %v1813_v54  }
 0x32a   : >> { %v1818_v56 = vpop.permute.xlu2 %1817 }
 0x332   : >> { %v1822_v55 = vpop.permute.xlu2 %1821 }
 0x333   : >> { %v1826_v61 = vsel %vm437_vm5, %v1822_v55, %v1818_v56  ;;  %v1824_v41 = vsel %vm437_vm5, %v1818_v56, %v1822_v55  ;;  %v3944_v56 = vsub.f32 %v3211_v21, %v3893_v35 }
 0x334   : >> { %v1829_v60 = vmul.f32 %v3372_v17, %v1826_v61  ;;  %v3896_v57 = vmul.f32 %v3374_v18, %v1824_v41  ;;  %v3961_v41 = vsub.f32 %v1861_v10, %v3924_v46 }
 0x336   : >> { %v3873_v62 = vand.u32 4294901760, %v1829_v60  ;;  %v3953_v55 = vand.u32 4294901760, %v3896_v57 }
 0x338   : >> { %v3921_v26 = vsub.f32 %v1829_v60, %v3873_v62  ;;  %v1927_v60 = vsub.f32 %v3877_v63, %v1926_v34 }
 0x33a   : >> { %v1928_v10 = vand.u32 4294901760, %v1927_v60 }
 0x341   : >> { %v1832_v33 = vpop.permute.xlu1 %1831  ;;  %v1834_v36 = vpop.permute.xlu0 %1833 }
 0x349   : >> { %v1836_v39 = vpop.permute.xlu1 %1835  ;;  %v1838_v4 = vpop.permute.xlu0 %1837 }
 0x34a   : >> { %v1839_v15 = vsel %vm446_vm6, %v1832_v33, %v1836_v39  ;;  %v1841_v28 = vsel %vm446_vm6, %v1836_v39, %v1832_v33  ;;  %v1840_v22 = vsel %vm446_vm6, %v1834_v36, %v1838_v4  ;;  %v1842_v32 = vsel %vm446_vm6, %v1838_v4, %v1834_v36 }
 0x34b   : >> { %v1843_v37 = vmul.f32 %v3378_v19, %v1839_v15  ;;  %v1844_v7 = vmul.f32 %v3380_v20, %v1841_v28  ;;  %v1845_v50 = vmul.f32 %v3378_v19, %v1840_v22  ;;  %v1846_v58 = vmul.f32 %v3380_v20, %v1842_v32 }
 0x34c   : >> { %v2168_v15 = vand.u32 4294901760, %v3933_v52  ;;  %v3972_v28 = vand.u32 4294901760, %v1888_v45  ;;  %v1933_v22 = vsub.f32 %v3881_v1, %v1932_v40  ;;  %v2174_v32 = vand.u32 4294901760, %v3944_v56 }
 0x34d   : >> { %v3884_v25 = vand.u32 4294901760, %v1843_v37  ;;  %v3886_v8 = vand.u32 4294901760, %v1844_v7  ;;  %v3888_v31 = vand.u32 4294901760, %v1845_v50  ;;  %v3890_v6 = vand.u32 4294901760, %v1846_v58 }
 0x34e   : >> { %v1938_v45 = vand.u32 4294901760, %v3921_v26 }
 0x34f   : >> { %v3907_v38 = vsub.f32 %v1844_v7, %v3886_v8  ;;  %v3910_v43 = vsub.f32 %v1846_v58, %v3890_v6  ;;  %1874 = vmatpush.msra.mxu0 %v3888_v31  ;;  %2007 = vmatpush.msra.mxu3 %v3888_v31  ;;  %v3915_v27 = vsub.f32 %v1845_v50, %v3888_v31 }
 0x350   : >> { %v3918_v29 = vsub.f32 %v1843_v37, %v3884_v25 }
 0x351   : >> { %v1820_v44 = vpop.permute.xlu1 %1819  ;;  %1876 = vmatpush.msra.mxu0 %v3884_v25  ;;  %1969 = vmatpush.msra.mxu2 %v3915_v27  ;;  %v1816_v51 = vpop.permute.xlu0 %1815  ;;  %v1914_v30 = vand.u32 4294901760, %v3915_v27  ;;  %v2156_v42 = vand.u32 4294901760, %v3910_v43  ;;  %v2162_v36 = vand.u32 4294901760, %v3907_v38 }
 0x352   : >> { %2009 = vmatpush.msra.mxu3 %v3884_v25  ;;  %v1823_v48 = vsel %vm437_vm5, %v1816_v51, %v1820_v44  ;;  %v1825_v47 = vsel %vm437_vm5, %v1820_v44, %v1816_v51  ;;  %v1920_v53 = vand.u32 4294901760, %v3918_v29  ;;  %v2169_v44 = vsub.f32 %v3933_v52, %v2168_v15 }
 0x353   : >> { %v1827_v12 = vmul.f32 %v3372_v17, %v1825_v47  ;;  %v1828_v24 = vmul.f32 %v3374_v18, %v1823_v48  ;;  %1878 = vmatpush.msra.mxu0 %v3848_v11  ;;  %1972 = vmatpush.msra.mxu2 %v3918_v29  ;;  %v1915_v33 = vsub.f32 %v3915_v27, %v1914_v30  ;;  %v3989_v27 = vand.u32 4294901760, %v3961_v41 }
 0x354   : >> { %2011 = vmatpush.msra.mxu3 %v3848_v11  ;;  %v1921_v61 = vsub.f32 %v3918_v29, %v1920_v53  ;;  %v2157_v13 = vsub.f32 %v3910_v43, %v2156_v42  ;;  %v2163_v58 = vsub.f32 %v3907_v38, %v2162_v36  ;;  %v3993_v29 = vsub.f32 %v3896_v57, %v3953_v55 }
 0x355   : >> { %v3963_v39 = vand.u32 4294901760, %v1827_v12  ;;  %1880 = vmatpush.msra.mxu0 %v3851_v14  ;;  %1975 = vmatpush.msra.mxu2 %v3877_v63  ;;  %v1916_v4 = vand.u32 4294901760, %v1915_v33  ;;  %v3978_v37 = vand.u32 4294901760, %v1828_v24  ;;  %v1934_v48 = vand.u32 4294901760, %v1933_v22 }
 0x356   : >> { %2013 = vmatpush.msra.mxu3 %v3851_v14  ;;  %v1922_v7 = vand.u32 4294901760, %v1921_v61  ;;  %v2158_v16 = vand.u32 4294901760, %v2157_v13  ;;  %v2164_v57 = vand.u32 4294901760, %v2163_v58  ;;  %v2175_v47 = vsub.f32 %v3944_v56, %v2174_v32 }
 0x357   : >> { %1882 = vmatpush.msra.mxu0 %v3873_v62  ;;  %1917 = vmatpush.msra.mxu1 %v1916_v4  ;;  %v1943_v50 = vsub.f32 %v1827_v12, %v3963_v39  ;;  %v4002_v54 = vsub.f32 %v1828_v24, %v3978_v37  ;;  %v1939_v12 = vsub.f32 %v3921_v26, %v1938_v45  ;;  %v2170_v24 = vand.u32 4294901760, %v2169_v44 }
 0x358   : >> { %1978 = vmatpush.msra.mxu2 %v3881_v1  ;;  %2015 = vmatpush.msra.mxu3 %v3873_v62  ;;  %v1896_v33 = vsub.f32 %v3961_v41, %v3989_v27  ;;  %v2180_v61 = vand.u32 4294901760, %v3993_v29  ;;  %v2176_v4 = vand.u32 4294901760, %v2175_v47 }
 0x359   : >> { %1884 = vmatpush.msra.mxu0 %v3963_v39  ;;  %1923 = vmatpush.msra.mxu1 %v1922_v7  ;;  %v1944_v51 = vand.u32 4294901760, %v1943_v50 }
 0x35a   : >> { %1981 = vmatpush.msra.mxu2 %v3921_v26  ;;  %2017 = vmatpush.msra.mxu3 %v3963_v39  ;;  %v1940_v26 = vand.u32 4294901760, %v1939_v12  ;;  %v1897_v13 = vand.u32 4294901760, %v1896_v33  ;;  %v2181_v22 = vsub.f32 %v3993_v29, %v2180_v61 }
 0x35b   : >> { %1890 = vmatmul.f32.vlgmr.msra.gmra.mxu0 %v3972_v28  ;;  %1929 = vmatpush.msra.mxu1 %v1928_v10  ;;  %v1945_v60 = vsub.f32 %v1943_v50, %v1944_v51 }
 0x35c   : >> { %2159 = vmatpush.msrb.mxu3 %v2158_v16  ;;  %2044 = vmatpush.msrb.mxu0 %v1914_v30  ;;  %v2186_v30 = vand.u32 4294901760, %v4002_v54  ;;  %v2182_v63 = vand.u32 4294901760, %v2181_v22 }
 0x35d   : >> { %1984 = vmatpush.msra.mxu2 %v1943_v50  ;;  %1935 = vmatpush.msra.mxu1 %v1934_v48 }
 0x35e   : >> { %2165 = vmatpush.msrb.mxu3 %v2164_v57  ;;  %1987 = vmatmul.f32.vlgmr.msra.gmra.mxu2 %v3844_v0  ;;  %v2187_v7 = vsub.f32 %v4002_v54, %v2186_v30 }
 0x35f   : >> { %2048 = vmatpush.msrb.mxu0 %v1920_v53  ;;  %2116 = vmatpush.msrb.mxu2 %v3890_v6  ;;  %v1946_v53 = vand.u32 4294901760, %v1945_v60 }
 0x360   : >> { %2021 = vmatmul.f32.vlgmr.msra.gmra.mxu3 %v3859_v5  ;;  %1941 = vmatpush.msra.mxu1 %v1940_v26  ;;  %v2188_v1 = vand.u32 4294901760, %v2187_v7 }
 0x361   : >> { %2052 = vmatpush.msrb.mxu0 %v1926_v34  ;;  %2118 = vmatpush.msrb.mxu2 %v3886_v8 }
 0x362   : >> { %2171 = vmatpush.msrb.mxu3 %v2170_v24  ;;  %1947 = vmatpush.msra.mxu1 %v1946_v53 }
 0x363   : >> { %2056 = vmatpush.msrb.mxu0 %v1932_v40  ;;  %2120 = vmatpush.msrb.mxu2 %v3854_v23 }
 0x364   : >> { %2177 = vmatpush.msrb.mxu3 %v2176_v4  ;;  %1898 = vmatmul.f32.gmra.mxu0 %v1897_v13 }
 0x365   : >> { %1949 = vmatmul.f32.vlgmr.msra.gmra.mxu1 %v3839_v49  ;;  %2060 = vmatpush.msrb.mxu0 %v1938_v45 }
 0x366   : >> { %2085 = vmatpush.msrb.mxu1 %v3888_v31  ;;  %2122 = vmatpush.msrb.mxu2 %v3893_v35 }
 0x367   : >> { %2183 = vmatpush.msrb.mxu3 %v2182_v63  ;;  %1992 = vmatmul.f32.gmra.mxu2 %v3961_v41 }
 0x368   : >> { %2064 = vmatpush.msrb.mxu0 %v1944_v51  ;;  %2087 = vmatpush.msrb.mxu1 %v3884_v25  ;;  %v1850_v25 = vpop.permute.xlu0 %1849 }
 0x369   : >> { %2124 = vmatpush.msrb.mxu2 %v3953_v55  ;;  %2189 = vmatpush.msrb.mxu3 %v2188_v1 }
 0x36a   : >> { %2211 = vmatpush.msra.mxu0 %v3910_v43  ;;  %2027 = vmatmul.f32.gmra.mxu3 %v3989_v27 }
 0x36b   : >> { %2327 = vmatpush.msra.mxu3 %v3890_v6  ;;  %2089 = vmatpush.msrb.mxu1 %v3848_v11  ;;  %v1814_v11 = vld [vmem:[%s3904_s25 + $0x8] sm:$0xff] }
 0x36c   : >> { %2126 = vmatpush.msrb.mxu2 %v3978_v37  ;;  %2214 = vmatpush.msra.mxu0 %v3907_v38 }
 0x36d   : >> { %2329 = vmatpush.msra.mxu3 %v3886_v8  ;;  %2091 = vmatpush.msrb.mxu1 %v3851_v14 }
 0x36e   : >> { %2286 = vmatpush.msra.mxu2 %v2156_v42  ;;  %2217 = vmatpush.msra.mxu0 %v3933_v52 }
 0x36f   : >> { %2331 = vmatpush.msra.mxu3 %v3854_v23  ;;  %1953 = vmatmul.f32.gmra.mxu1 %v3924_v46 }
 0x370   : >> { %2290 = vmatpush.msra.mxu2 %v2162_v36  ;;  %2066 = vmatmul.f32.vlgmr.msrb.gmra.mxu0 %v3839_v49 }
 0x371   : >> { %2093 = vmatpush.msrb.mxu1 %v3873_v62  ;;  %2220 = vmatpush.msra.mxu0 %v3944_v56 }
 0x372   : >> { %2294 = vmatpush.msra.mxu2 %v2168_v15  ;;  %2333 = vmatpush.msra.mxu3 %v3893_v35 }
 0x373   : >> { %2095 = vmatpush.msrb.mxu1 %v3963_v39  ;;  %2132 = vmatmul.f32.vlgmr.msrb.gmra.mxu2 %v3972_v28 }
 0x374   : >> { %2223 = vmatpush.msra.mxu0 %v3993_v29  ;;  %2298 = vmatpush.msra.mxu2 %v2174_v32 }
 0x375   : >> { %2249 = vmatpush.msra.mxu1 %v3890_v6  ;;  %2335 = vmatpush.msra.mxu3 %v3953_v55 }
 0x376   : >> { %2191 = vmatmul.f32.vlgmr.msrb.gmra.mxu3 %v3839_v49  ;;  %2226 = vmatpush.msra.mxu0 %v4002_v54 }
 0x377   : >> { %2251 = vmatpush.msra.mxu1 %v3886_v8  ;;  %2302 = vmatpush.msra.mxu2 %v2180_v61 }
 0x378   : >> { %2337 = vmatpush.msra.mxu3 %v3978_v37  ;;  %2070 = vmatmul.f32.gmra.mxu0 %v3924_v46 }
 0x379   : >> { %2253 = vmatpush.msra.mxu1 %v3854_v23  ;;  %2306 = vmatpush.msra.mxu2 %v2186_v30 }
 0x37a   : >> { %2097 = vmatmul.f32.vlgmr.msrb.gmra.mxu1 %v3839_v49  ;;  %1854 = vperm.xlu2 %3114, %v1814_v11   ;;  %v2356_v11 = vld [vmem:[%s4099_s16 + $0x8] sm:$0xff] }
 0x37b   : >> { %2255 = vmatpush.msra.mxu1 %v3893_v35  ;;  %2140 = vmatmul.f32.gmra.mxu2 %v1897_v13 }
 0x37d   : >> { %2257 = vmatpush.msra.mxu1 %v3953_v55 }
 0x37e   : >> { %2195 = vmatmul.f32.gmra.mxu3 %v3924_v46 }
 0x37f   : >> { %2259 = vmatpush.msra.mxu1 %v3978_v37 }
 0x380   : >> { %2229 = vmatmul.f32.vlgmr.msra.gmra.mxu0 %v3844_v0 }
 0x382   : >> { %2101 = vmatmul.f32.gmra.mxu1 %v3924_v46 }
 0x383   : >> { %2308 = vmatmul.f32.vlgmr.msra.gmra.mxu2 %v3839_v49 }
 0x386   : >> { %2339 = vmatmul.f32.vlgmr.msra.gmra.mxu3 %v3839_v49 }
 0x388   : >> { %2234 = vmatmul.f32.gmra.mxu0 %v3961_v41 }
 0x38a   : >> { %2263 = vmatmul.f32.vlgmr.msra.gmra.mxu1 %v3859_v5 }
 0x38b   : >> { %2312 = vmatmul.f32.gmra.mxu2 %v3924_v46 }
 0x38e   : >> { %2343 = vmatmul.f32.gmra.mxu3 %v3924_v46 }
 0x392   : >> { %2269 = vmatmul.f32.gmra.mxu1 %v3989_v27 }
 0x3d4   : >> { %v1855_v35 = vpop.permute.xlu2 %1854 }
 0x3d8   : >> { %v1891_v14 = vpop.f32.mrf.mxu0 }
 0x3d9   : >> { %v1892_v31 = vadd.f32 %v1891_v14, %v1850_v25 }
 0x3e1   : >> { %v1988_v23 = vpop.f32.mrf.mxu2  ;;  %v1899_v62 = vpop.f32.mrf.mxu0 }
 0x3e2   : >> { %v1950_v0 = vpop.f32.mrf.mxu1  ;;  %v1900_v42 = vadd.f32 %v1899_v62, %v1855_v35 }
 0x3e3   : >> { %v2022_v8 = vpop.f32.mrf.mxu3  ;;  %v1951_v6 = vadd.f32 %v1950_v0, %v1892_v31 }
 0x3e5   : >> { %v1989_v5 = vadd.f32 %v1988_v23, %v1951_v6  ;;  %v2352_v6 = vld [vmem:[%s4106_s0] sm:$0xff] }
 0x3e7   : >> { %v2023_v40 = vadd.f32 %v2022_v8, %v1989_v5 }
 0x3ea   : >> { %v1993_v49 = vpop.f32.mrf.mxu2 }
 0x3ec   : >> { %v1954_v38 = vpop.f32.mrf.mxu1 }
 0x3ed   : >> { %v2067_v43 = vpop.f32.mrf.mxu0  ;;  %v2028_v34 = vpop.f32.mrf.mxu3  ;;  %v1955_v52 = vadd.f32 %v1954_v38, %v1900_v42 }
 0x3ee   : >> { %v2068_v46 = vadd.f32 %v2067_v43, %v2023_v40 }
 0x3ef   : >> { %v1994_v41 = vadd.f32 %v1993_v49, %v1955_v52  ;;  %v2400_v52 = vsel %vm924_vm7, %v2352_v6, 0 }
 0x3f1   : >> { %v2029_v32 = vadd.f32 %v2028_v34, %v1994_v41 }
 0x3f5   : >> { %v2071_v36 = vpop.f32.mrf.mxu0 }
 0x3f6   : >> { %v2133_v56 = vpop.f32.mrf.mxu2  ;;  %v2072_v37 = vadd.f32 %v2071_v36, %v2029_v32 }
 0x3f7   : >> { %v2098_v55 = vpop.f32.mrf.mxu1  ;;  %v2134_v10 = vadd.f32 %v2133_v56, %v1850_v25 }
 0x3f8   : >> { %v2099_v39 = vadd.f32 %v2098_v55, %v2068_v46 }
 0x3f9   : >> { %v2192_v15 = vpop.f32.mrf.mxu3 }
 0x3fa   : >> { %v2347_v28 = vmax.f32 %v2099_v39, 0.0  ;;  %v2193_v44 = vadd.f32 %v2192_v15, %v2134_v10  ;;  %v4144_v39 = vand.u32 4294901760, %v2400_v52 }
 0x3fc   : >> { %2373 = vrot.lane.b32.xlu1 %v2347_v28, %s3225_s24  ;;  %v4113_v31 = vand.u32 4294901760, %v2347_v28 }
 0x3fd   : >> { %v2230_v27 = vpop.f32.mrf.mxu0 }
 0x3fe   : >> { %v2141_v50 = vpop.f32.mrf.mxu2  ;;  %v2231_v51 = vadd.f32 %v2230_v27, %v2193_v44  ;;  %v4135_v46 = vsub.f32 %v2347_v28, %v4113_v31 }
 0x3ff   : >> { %v2102_v58 = vpop.f32.mrf.mxu1  ;;  %v2142_v48 = vadd.f32 %v2141_v50, %v1855_v35 }
 0x400   : >> { %v2103_v45 = vadd.f32 %v2102_v58, %v2072_v37 }
 0x401   : >> { %v2196_v29 = vpop.f32.mrf.mxu3 }
 0x402   : >> { %v2349_v16 = vmax.f32 %v2103_v45, 0.0  ;;  %v2197_v61 = vadd.f32 %v2196_v29, %v2142_v48  ;;  %v2474_v29 = vand.u32 4294901760, %v4135_v46 }
 0x404   : >> { %2359 = vrot.lane.b32.xlu0 %v2349_v16, %s3226_s13  ;;  %2375 = vrot.lane.b32.xlu1 %v2349_v16, %s3225_s24  ;;  %v4111_v8 = vand.u32 4294901760, %v2349_v16 }
 0x405   : >> { %v2235_v24 = vpop.f32.mrf.mxu0 }
 0x406   : >> { %v2309_v54 = vpop.f32.mrf.mxu2  ;;  %v2236_v4 = vadd.f32 %v2235_v24, %v2197_v61  ;;  %v4130_v40 = vsub.f32 %v2349_v16, %v4111_v8  ;;  %v2353_v16 = vld [vmem:[%s4106_s0 + $0x8] sm:$0xff]  ;;  %s3021_s0 = sshll.u32 (%p1800_p11), %s3312_s21, 4 }
 0x407   : >> { %v2264_v57 = vpop.f32.mrf.mxu1 }
 0x408   : >> { %v2265_v47 = vadd.f32 %v2264_v57, %v2231_v51  ;;  %v2468_v32 = vand.u32 4294901760, %v4130_v40  ;;  %v4167_v51 = vsub.f32 %v2400_v52, %v4144_v39 }
 0x409   : >> { %v2340_v12 = vpop.f32.mrf.mxu3 }
 0x40a   : >> { %v2310_v33 = vadd.f32 %v2309_v54, %v2265_v47  ;;  %v2469_v48 = vsub.f32 %v4130_v40, %v2468_v32 }
 0x40c   : >> { %v2341_v60 = vadd.f32 %v2340_v12, %v2310_v33  ;;  %v2403_v12 = vsel %vm924_vm7, %v2353_v16, 0 }
 0x40e   : >> { %v4082_v30 = vmax.f32 %v2341_v60, 0.0  ;;  %v2313_v13 = vpop.f32.mrf.mxu2  ;;  %v2475_v60 = vsub.f32 %v4135_v46, %v2474_v29 }
 0x40f   : >> { %v2270_v26 = vpop.f32.mrf.mxu1 }
 0x410   : >> { %v2271_v22 = vadd.f32 %v2270_v26, %v2236_v4  ;;  %2361 = vrot.lane.b32.xlu0 %v4082_v30, %s3226_s13  ;;  %v4193_v4 = vand.u32 4294901760, %v4167_v51 }
 0x411   : >> { %v2344_v53 = vpop.f32.mrf.mxu3 }
 0x412   : >> { %v2314_v7 = vadd.f32 %v2313_v13, %v2271_v22  ;;  %v2470_v22 = vand.u32 4294901760, %v2469_v48 }
 0x414   : >> { %v2345_v63 = vadd.f32 %v2344_v53, %v2314_v7  ;;  %v4199_v53 = vand.u32 4294901760, %v2403_v12  ;;  %v4202_v7 = vand.u32 4294901760, %v4082_v30 }
 0x416   : >> { %v4086_v1 = vmax.f32 %v2345_v63, 0.0  ;;  %v4228_v52 = vsub.f32 %v2403_v12, %v4199_v53 }
 0x418   : >> { %2363 = vrot.lane.b32.xlu1 %v4086_v1, %s3226_s13  ;;  %2379 = vrot.lane.b32.xlu2 %v4086_v1, %s3225_s24  ;;  %v4183_v33 = vand.u32 4294901760, %v4086_v1 }
 0x420   : >> { %2377 = vrot.lane.b32.xlu2 %v4082_v30, %s3225_s24 }
 0x428   : >> { %2357 = vrot.lane.b32.xlu2 %v2347_v28, %s3226_s13  ;;  %s2913_s13 = scalar_lea.hbm (%p1800_p11), %s4416_s11, %s3021_s0 }
 0x429   : > { %s2916_s12 = sshll.u32 (%p1800_p11), %s2913_s13, 4  ;;  %s2917_s12 = int_to_ptr.hbm [resolvable:$true] %s2916_s12 }
 0x430   : >> { %2396 = vperm.xlu2 %3114, %v2356_v11   ;;  %v2355_v11 = vld [vmem:[%s4099_s16] sm:$0xff]  ;;  %s3131_s16 = sshra.s32 (%p1800_p11), %s2917_s12, 4  ;;  %s3132_s16 = int_to_ptr.hbm [resolvable:$true] %s3131_s16 }
 0x431   : >> { %2391 = vperm.xlu1 %3116, %v2355_v11   ;;  %s3133_s25 = scalar_lea.hbm (%p1800_p11), %s3132_s16, 32  ;;  %p3138_p1 = scmp.lt.s32.totalorder (%p1800_p11), %s3132_s16, %s4416_s11 }
 0x432   : > { %p3134_p12 = scmp.ne.s32.totalorder (%p1800_p11), %s3132_s16, %s3133_s25  ;;  %p3139_p2 = scmp.lt.s32.totalorder (%p1800_p11), %s3137_s22, %s3133_s25 }
 0x434   : > { %p3135_p13 = pnand (%p1800_p11), %p3134_p12, %p3329_p5  ;;  %p3140_p3 = por (%p1800_p11), %p3139_p2, %p3138_p1 }
 0x436   : > { %p3136_p0 = pneg (%p1800_p11), %p3135_p13 }
 0x438   : > { %p3141_p4 = pnand (%p1800_p11), %p3140_p3, %p3136_p0 }
 0x46e   : >> { %v2374_v14 = vpop.permute.xlu1 %2373 }
 0x472   : >> { %v2380_v23 = vpop.permute.xlu2 %2379 }
 0x476   : >> { %v2376_v62 = vpop.permute.xlu1 %2375  ;;  %v4118_v49 = vpop.permute.xlu0 %2359 }
 0x477   : >> { %v2382_v0 = vsel %vm446_vm6, %v2376_v62, %v2380_v23  ;;  %v2384_v43 = vsel %vm446_vm6, %v2380_v23, %v2376_v62  ;;  %v2476_v62 = vand.u32 4294901760, %v2475_v60 }
 0x478   : >> { %v2387_v25 = vmul.f32 %v3378_v19, %v2382_v0  ;;  %v2388_v56 = vmul.f32 %v3380_v20, %v2384_v43  ;;  %v4211_v0 = vsub.f32 %v4086_v1, %v4183_v33  ;;  %v2430_v43 = vsub.f32 %v4167_v51, %v4193_v4 }
 0x47a   : >> { %v4116_v35 = vand.u32 4294901760, %v2387_v25  ;;  %v2378_v38 = vpop.permute.xlu2 %2377  ;;  %v4156_v50 = vand.u32 4294901760, %v2388_v56 }
 0x47b   : >> { %v2381_v34 = vsel %vm446_vm6, %v2374_v14, %v2378_v38  ;;  %v2383_v55 = vsel %vm446_vm6, %v2378_v38, %v2374_v14 }
 0x47c   : >> { %v4125_v5 = vsub.f32 %v2387_v25, %v4116_v35  ;;  %v2385_v42 = vmul.f32 %v3378_v19, %v2381_v34  ;;  %2416 = vmatpush.msrb.mxu0 %v4116_v35  ;;  %2549 = vmatpush.msrb.mxu3 %v4116_v35  ;;  %v2386_v37 = vmul.f32 %v3380_v20, %v2383_v55 }
 0x47d   : >> { %v4186_v24 = vsub.f32 %v2388_v56, %v4156_v50  ;;  %v4233_v55 = vsub.f32 %v4082_v30, %v4202_v7 }
 0x47e   : >> { %v2456_v36 = vand.u32 4294901760, %v4125_v5  ;;  %v4141_v41 = vand.u32 4294901760, %v2385_v42  ;;  %2511 = vmatpush.msrb.mxu2 %v4125_v5  ;;  %v4177_v47 = vand.u32 4294901760, %v2386_v37 }
 0x47f   : >> { %v2698_v14 = vand.u32 4294901760, %v4186_v24  ;;  %v2716_v48 = vand.u32 4294901760, %v4233_v55 }
 0x480   : >> { %2418 = vmatpush.msrb.mxu0 %v4141_v41  ;;  %2551 = vmatpush.msrb.mxu3 %v4141_v41  ;;  %v4149_v15 = vsub.f32 %v2385_v42, %v4141_v41  ;;  %v2457_v28 = vsub.f32 %v4125_v5, %v2456_v36  ;;  %v4205_v63 = vsub.f32 %v2386_v37, %v4177_v47 }
 0x481   : >> { %v2699_v37 = vsub.f32 %v4186_v24, %v2698_v14 }
 0x482   : >> { %v2362_v58 = vpop.permute.xlu0 %2361  ;;  %2420 = vmatpush.msrb.mxu0 %v4111_v8  ;;  %2514 = vmatpush.msrb.mxu2 %v4149_v15  ;;  %v2358_v10 = vpop.permute.xlu2 %2357  ;;  %v2458_v45 = vand.u32 4294901760, %v2457_v28  ;;  %v2462_v27 = vand.u32 4294901760, %v4149_v15  ;;  %v2704_v56 = vand.u32 4294901760, %v4205_v63 }
 0x483   : >> { %2553 = vmatpush.msrb.mxu3 %v4111_v8  ;;  %v2367_v44 = vsel %vm437_vm5, %v2362_v58, %v2358_v10  ;;  %v2365_v26 = vsel %vm437_vm5, %v2358_v10, %v2362_v58  ;;  %v4244_v10 = vand.u32 4294901760, %v2430_v43  ;;  %v2700_v12 = vand.u32 4294901760, %v2699_v37 }
 0x484   : >> { %v2369_v54 = vmul.f32 %v3372_v17, %v2367_v44  ;;  %2422 = vmatpush.msrb.mxu0 %v4113_v31  ;;  %2459 = vmatpush.msrb.mxu1 %v2458_v45  ;;  %v2463_v57 = vsub.f32 %v4149_v15, %v2462_v27  ;;  %v2370_v25 = vmul.f32 %v3374_v18, %v2365_v26  ;;  %v2710_v45 = vand.u32 4294901760, %v4211_v0 }
 0x485   : >> { %2517 = vmatpush.msrb.mxu2 %v4130_v40  ;;  %2555 = vmatpush.msrb.mxu3 %v4113_v31 }
 0x486   : >> { %v2464_v61 = vand.u32 4294901760, %v2463_v57  ;;  %v4197_v13 = vand.u32 4294901760, %v2369_v54  ;;  %v4242_v58 = vand.u32 4294901760, %v2370_v25  ;;  %v2705_v57 = vsub.f32 %v4205_v63, %v2704_v56 }
 0x487   : >> { %2520 = vmatpush.msrb.mxu2 %v4135_v46  ;;  %v2711_v26 = vsub.f32 %v4211_v0, %v2710_v45 }
 0x488   : >> { %2465 = vmatpush.msrb.mxu1 %v2464_v61  ;;  %v4225_v1 = vsub.f32 %v2369_v54, %v4197_v13  ;;  %v4255_v54 = vand.u32 4294901760, %v4228_v52  ;;  %v4263_v60 = vsub.f32 %v2370_v25, %v4242_v58  ;;  %v2706_v25 = vand.u32 4294901760, %v2705_v57 }
 0x48a   : >> { %v2364_v23 = vpop.permute.xlu1 %2363  ;;  %2471 = vmatpush.msrb.mxu1 %v2470_v22  ;;  %v2486_v44 = vand.u32 4294901760, %v4225_v1 }
 0x48b   : >> { %v2366_v6 = vsel %vm437_vm5, %v4118_v49, %v2364_v23  ;;  %v2368_v38 = vsel %vm437_vm5, %v2364_v23, %v4118_v49  ;;  %v2438_v23 = vsub.f32 %v4228_v52, %v4255_v54 }
 0x48c   : >> { %v2371_v34 = vmul.f32 %v3372_v17, %v2368_v38  ;;  %v2372_v42 = vmul.f32 %v3374_v18, %v2366_v6  ;;  %2477 = vmatpush.msrb.mxu1 %v2476_v62  ;;  %v2487_v11 = vsub.f32 %v4225_v1, %v2486_v44  ;;  %v2717_v6 = vsub.f32 %v4233_v55, %v2716_v48 }
 0x48d   : >> { %v2728_v38 = vand.u32 4294901760, %v4263_v60 }
 0x48e   : >> { %v4235_v49 = vand.u32 4294901760, %v2371_v34  ;;  %v4237_v28 = vand.u32 4294901760, %v2372_v42  ;;  %v2488_v43 = vand.u32 4294901760, %v2487_v11  ;;  %v2718_v15 = vand.u32 4294901760, %v2717_v6 }
 0x48f   : >> { %v2729_v40 = vsub.f32 %v4263_v60, %v2728_v38 }
 0x490   : >> { %v4248_v16 = vsub.f32 %v2372_v42, %v4237_v28  ;;  %2424 = vmatpush.msrb.mxu0 %v4235_v49  ;;  %2557 = vmatpush.msrb.mxu3 %v4235_v49  ;;  %v2479_v30 = vsub.f32 %v2371_v34, %v4235_v49  ;;  %v2439_v34 = vand.u32 4294901760, %v2438_v23 }
 0x491   : >> { %v2730_v46 = vand.u32 4294901760, %v2729_v40 }
 0x492   : >> { %2426 = vmatpush.msrb.mxu0 %v4197_v13  ;;  %2523 = vmatpush.msrb.mxu2 %v2479_v30  ;;  %v2480_v61 = vand.u32 4294901760, %v2479_v30  ;;  %v2722_v62 = vand.u32 4294901760, %v4248_v16 }
 0x493   : >> { %2559 = vmatpush.msrb.mxu3 %v4197_v13  ;;  %2432 = vmatmul.f32.vlgmr.msrb.gmra.mxu0 %v4244_v10 }
 0x494   : >> { %2586 = vmatpush.msra.mxu0 %v2456_v36  ;;  %v2481_v22 = vsub.f32 %v2479_v30, %v2480_v61  ;;  %2526 = vmatpush.msrb.mxu2 %v4225_v1  ;;  %v2712_v36 = vand.u32 4294901760, %v2711_v26  ;;  %v2723_v42 = vsub.f32 %v4248_v16, %v2722_v62 }
 0x495   : >> { %2701 = vmatpush.msra.mxu3 %v2700_v12  ;;  %2529 = vmatmul.f32.vlgmr.msrb.gmra.mxu2 %v4167_v51 }
 0x496   : >> { %2563 = vmatmul.f32.vlgmr.msrb.gmra.mxu3 %v4193_v4  ;;  %2590 = vmatpush.msra.mxu0 %v2462_v27  ;;  %v2482_v5 = vand.u32 4294901760, %v2481_v22 }
 0x497   : >> { %2658 = vmatpush.msra.mxu2 %v4156_v50  ;;  %2707 = vmatpush.msra.mxu3 %v2706_v25 }
 0x498   : >> { %2594 = vmatpush.msra.mxu0 %v2468_v32  ;;  %2483 = vmatpush.msrb.mxu1 %v2482_v5  ;;  %v2724_v32 = vand.u32 4294901760, %v2723_v42 }
 0x499   : >> { %2660 = vmatpush.msra.mxu2 %v4177_v47  ;;  %2713 = vmatpush.msra.mxu3 %v2712_v36 }
 0x49a   : >> { %2598 = vmatpush.msra.mxu0 %v2474_v29  ;;  %2489 = vmatpush.msrb.mxu1 %v2488_v43 }
 0x49b   : >> { %2662 = vmatpush.msra.mxu2 %v4183_v33  ;;  %2719 = vmatpush.msra.mxu3 %v2718_v15 }
 0x49c   : >> { %2440 = vmatmul.f32.gmra.mxu0 %v2439_v34  ;;  %2491 = vmatmul.f32.vlgmr.msrb.gmra.mxu1 %v4144_v39 }
 0x49d   : >> { %2602 = vmatpush.msra.mxu0 %v2480_v61  ;;  %2627 = vmatpush.msra.mxu1 %v4116_v35 }
 0x49e   : >> { %2664 = vmatpush.msra.mxu2 %v4202_v7  ;;  %2725 = vmatpush.msra.mxu3 %v2724_v32 }
 0x49f   : >> { %2534 = vmatmul.f32.gmra.mxu2 %v4228_v52  ;;  %2606 = vmatpush.msra.mxu0 %v2486_v44 }
 0x4a0   : >> { %2629 = vmatpush.msra.mxu1 %v4141_v41  ;;  %2666 = vmatpush.msra.mxu2 %v4237_v28 }
 0x4a1   : >> { %2731 = vmatpush.msra.mxu3 %v2730_v46  ;;  %2753 = vmatpush.msrb.mxu0 %v4186_v24 }
 0x4a2   : >> { %2631 = vmatpush.msra.mxu1 %v4111_v8  ;;  %2569 = vmatmul.f32.gmra.mxu3 %v4255_v54 }
 0x4a3   : >> { %2869 = vmatpush.msrb.mxu3 %v4156_v50  ;;  %2668 = vmatpush.msra.mxu2 %v4242_v58 }
 0x4a4   : >> { %2756 = vmatpush.msrb.mxu0 %v4205_v63  ;;  %2633 = vmatpush.msra.mxu1 %v4113_v31 }
 0x4a5   : >> { %2828 = vmatpush.msrb.mxu2 %v2698_v14  ;;  %2871 = vmatpush.msrb.mxu3 %v4177_v47 }
 0x4a6   : >> { %2759 = vmatpush.msrb.mxu0 %v4211_v0  ;;  %2495 = vmatmul.f32.gmra.mxu1 %v4199_v53 }
 0x4a7   : >> { %2832 = vmatpush.msrb.mxu2 %v2704_v56  ;;  %2873 = vmatpush.msrb.mxu3 %v4183_v33 }
 0x4a8   : >> { %2608 = vmatmul.f32.vlgmr.msra.gmra.mxu0 %v4144_v39  ;;  %2635 = vmatpush.msra.mxu1 %v4235_v49 }
 0x4a9   : >> { %2762 = vmatpush.msrb.mxu0 %v4233_v55  ;;  %2836 = vmatpush.msrb.mxu2 %v2710_v45 }
 0x4aa   : >> { %2875 = vmatpush.msrb.mxu3 %v4202_v7  ;;  %2637 = vmatpush.msra.mxu1 %v4197_v13 }
 0x4ab   : >> { %2674 = vmatmul.f32.vlgmr.msra.gmra.mxu2 %v4244_v10  ;;  %2765 = vmatpush.msrb.mxu0 %v4248_v16 }
 0x4ac   : >> { %2791 = vmatpush.msrb.mxu1 %v4156_v50  ;;  %2840 = vmatpush.msrb.mxu2 %v2716_v48  ;;  %v2392_v50 = vpop.permute.xlu1 %2391 }
 0x4ad   : >> { %2877 = vmatpush.msrb.mxu3 %v4237_v28  ;;  %2768 = vmatpush.msrb.mxu0 %v4263_v60 }
 0x4ae   : >> { %2733 = vmatmul.f32.vlgmr.msra.gmra.mxu3 %v4144_v39  ;;  %2793 = vmatpush.msrb.mxu1 %v4177_v47 }
 0x4af   : >> { %2844 = vmatpush.msrb.mxu2 %v2722_v62  ;;  %2879 = vmatpush.msrb.mxu3 %v4242_v58 }
 0x4b0   : >> { %2795 = vmatpush.msrb.mxu1 %v4183_v33  ;;  %2612 = vmatmul.f32.gmra.mxu0 %v4199_v53 }
 0x4b1   : >> { %2848 = vmatpush.msrb.mxu2 %v2728_v38  ;;  %2639 = vmatmul.f32.vlgmr.msra.gmra.mxu1 %v4144_v39 }
 0x4b2   : >> { %2797 = vmatpush.msrb.mxu1 %v4202_v7 }
 0x4b3   : >> { %2682 = vmatmul.f32.gmra.mxu2 %v2439_v34 }
 0x4b4   : >> { %2799 = vmatpush.msrb.mxu1 %v4237_v28 }
 0x4b6   : >> { %2737 = vmatmul.f32.gmra.mxu3 %v4199_v53  ;;  %2801 = vmatpush.msrb.mxu1 %v4242_v58 }
 0x4b8   : >> { %2771 = vmatmul.f32.vlgmr.msrb.gmra.mxu0 %v4167_v51 }
 0x4b9   : >> { %2643 = vmatmul.f32.gmra.mxu1 %v4199_v53 }
 0x4bb   : >> { %2850 = vmatmul.f32.vlgmr.msrb.gmra.mxu2 %v4144_v39 }
 0x4be   : >> { %2881 = vmatmul.f32.vlgmr.msrb.gmra.mxu3 %v4144_v39 }
 0x4c0   : >> { %2776 = vmatmul.f32.gmra.mxu0 %v4228_v52 }
 0x4c1   : >> { %2805 = vmatmul.f32.vlgmr.msrb.gmra.mxu1 %v4193_v4  ;;  %v2397_v4 = vpop.permute.xlu2 %2396 }
 0x4c3   : >> { %2854 = vmatmul.f32.gmra.mxu2 %v4199_v53 }
 0x4c6   : >> { %2885 = vmatmul.f32.gmra.mxu3 %v4199_v53 }
 0x4c9   : >> { %2811 = vmatmul.f32.gmra.mxu1 %v4255_v54 }
 0x510   : >> { %v2433_v8 = vpop.f32.mrf.mxu0 }
 0x511   : >> { %v2434_v29 = vadd.f32 %v2433_v8, %v2392_v50 }
 0x518   : >> { %v2530_v35 = vpop.f32.mrf.mxu2 }
 0x519   : >> { %v2492_v31 = vpop.f32.mrf.mxu1  ;;  %v2441_v41 = vpop.f32.mrf.mxu0 }
 0x51a   : >> { %v2564_v27 = vpop.f32.mrf.mxu3  ;;  %v2493_v51 = vadd.f32 %v2492_v31, %v2434_v29  ;;  %v2442_v7 = vadd.f32 %v2441_v41, %v2397_v4 }
 0x51c   : >> { %v2531_v24 = vadd.f32 %v2530_v35, %v2493_v51 }
 0x51e   : >> { %v2565_v63 = vadd.f32 %v2564_v27, %v2531_v24 }
 0x522   : >> { %v2535_v39 = vpop.f32.mrf.mxu2 }
 0x523   : >> { %v2496_v47 = vpop.f32.mrf.mxu1 }
 0x524   : >> { %v2497_v14 = vadd.f32 %v2496_v47, %v2442_v7 }
 0x525   : >> { %v2609_v33 = vpop.f32.mrf.mxu0  ;;  %v2570_v13 = vpop.f32.mrf.mxu3 }
 0x526   : >> { %v2610_v53 = vadd.f32 %v2609_v33, %v2565_v63  ;;  %v2536_v56 = vadd.f32 %v2535_v39, %v2497_v14 }
 0x528   : >> { %v2571_v37 = vadd.f32 %v2570_v13, %v2536_v56 }
 0x52d   : >> { %v2613_v0 = vpop.f32.mrf.mxu0 }
 0x52e   : >> { %v2640_v1 = vpop.f32.mrf.mxu1  ;;  %v2675_v52 = vpop.f32.mrf.mxu2  ;;  %v2614_v10 = vadd.f32 %v2613_v0, %v2571_v37 }
 0x52f   : >> { %v2641_v55 = vadd.f32 %v2640_v1, %v2610_v53  ;;  %v2676_v30 = vadd.f32 %v2675_v52, %v2392_v50 }
 0x531   : >> { %v2889_v49 = vadd.f32 %v3215_v9, %v2641_v55  ;;  %v2734_v28 = vpop.f32.mrf.mxu3 }
 0x532   : >> { %v2735_v12 = vadd.f32 %v2734_v28, %v2676_v30 }
 0x533   : >> { %v2893_v58 = vmax.f32 %v2889_v49, 0.0  }
 0x535   : >> { %v2772_v54 = vpop.f32.mrf.mxu0  ;;  %2897 = vst [vmem:[%s3788_s30] sm:$0xff] (%p1800_p11), %v2893_v58 }
 0x536   : >> { %v2644_v45 = vpop.f32.mrf.mxu1  ;;  %v2683_v16 = vpop.f32.mrf.mxu2  ;;  %v2773_v60 = vadd.f32 %v2772_v54, %v2735_v12 }
 0x537   : >> { %v2645_v44 = vadd.f32 %v2644_v45, %v2614_v10  ;;  %v2684_v11 = vadd.f32 %v2683_v16, %v2397_v4 }
 0x539   : >> { %v2891_v57 = vadd.f32 %v3207_v2, %v2645_v44  ;;  %v2738_v48 = vpop.f32.mrf.mxu3 }
 0x53a   : >> { %v2739_v6 = vadd.f32 %v2738_v48, %v2684_v11 }
 0x53b   : >> { %v2895_v61 = vmax.f32 %v2891_v57, 0.0  }
 0x53d   : >> { %v2777_v25 = vpop.f32.mrf.mxu0  ;;  %2899 = vst [vmem:[%s3788_s30 + $0x10] sm:$0xff] (%p1800_p11), %v2895_v61 }
 0x53e   : >> { %v2806_v26 = vpop.f32.mrf.mxu1  ;;  %v2851_v22 = vpop.f32.mrf.mxu2  ;;  %v2778_v36 = vadd.f32 %v2777_v25, %v2739_v6 }
 0x53f   : >> { %v2807_v23 = vadd.f32 %v2806_v26, %v2773_v60 }
 0x541   : >> { %v2852_v9 = vadd.f32 %v2851_v22, %v2807_v23  ;;  %v2882_v62 = vpop.f32.mrf.mxu3 }
 0x543   : >> { %v2883_v5 = vadd.f32 %v2882_v62, %v2852_v9  ;;  %v4427_v9 = vmov %v2893_v58 }
 0x545   : >> { %v2890_v38 = vadd.f32 %v3211_v21, %v2883_v5 }
 0x546   : >> { %v2812_v43 = vpop.f32.mrf.mxu1  ;;  %v2855_v34 = vpop.f32.mrf.mxu2 }
 0x547   : >> { %v2894_v42 = vmax.f32 %v2890_v38, 0.0   ;;  %v2813_v2 = vadd.f32 %v2812_v43, %v2778_v36 }
 0x549   : >> { %v2856_v15 = vadd.f32 %v2855_v34, %v2813_v2  ;;  %v2886_v40 = vpop.f32.mrf.mxu3  ;;  %v4425_v2 = vmov %v2895_v61  ;;  %v4426_v21 = vmov %v2894_v42  ;;  %2898 = vst [vmem:[%s3788_s30 + $0x8] sm:$0xff] (%p1800_p11), %v2894_v42 }
 0x54b   : >> { %v2887_v32 = vadd.f32 %v2886_v40, %v2856_v15 }
 0x54d   : >> { %v2892_v46 = vadd.f32 %v3203_v59, %v2887_v32  ;;  %1802 = sbr.rel (!%p1800_p11) target bundleno = 718 (0x2ce), region = 110 }
 0x54f   : >> { %v2896_v8 = vmax.f32 %v2892_v46, 0.0  }
 0x551   : >> { %v4424_v59 = vmov %v2896_v8  ;;  %2900 = vst [vmem:[%s3788_s30 + $0x18] sm:$0xff] (%p1800_p11), %v2896_v8 }
 0x552   : > { %3144 = shalt.err (!%p3141_p4)
}
 0x553   : > { %s3228_s30 = smov 256   ;;  %s3229_s13 = smov 512  }
 0x554   : > { %s3230_s15 = smov 16  }
 0x555   : > { %3022 = dma.vmem_to_hbm [thread:$0]  (%p3329_p5), %s2915_s14, 512, %s2917_s12, %s2902_s29, %s3228_s30, %s3229_s13, %s3230_s15  }
 0x556 PF: > { %p3028_p7 = scmp.ge.s32.totalorder %s3199_s20, 2  ;;  %s2931_s1 = sand.u32 1, %s3187_s17  }
 0x557   : > { %s2932_s16 = scalar_lea.sflag [#allocation3], %s2931_s1 }
 0x558   : > { %p3025_p8 = pnand %p3028_p7, %p3333_p6 }
 0x55a   : > { %p3026_p9 = pneg %p3025_p8 }
 0x55c   : > { %3182 = dma.done.wait (%p3026_p9), %s2932_s16, 512  }
 0x55d   : > { %3184 = vsyncadd (%p3026_p9), %s2932_s16, 4294966784  ;;  %p21_p10 = scmp.ge.s32.totalorder %s3316_s23, 4   ;;  %s4429_s17 = smov %s3191_s18 }
 0x55e   : > { %s4430_s18 = smov %s3195_s19  ;;  %s4431_s19 = smov %s3327_s26 }
 0x55f   : > { %s4432_s20 = smov %s3316_s23  ;;  %23 = sbr.rel (!%p21_p10) target bundleno = 6 (0x6), region = 121 }
 0x564   :  { %2938 = vsyncpa [#allocation3], 1 }
 0x565   :  { %2940 = vsyncpa [#allocation3 + $0x1], 1 }

</bundles_post_ra>
